<compile_context>
chip_gen: v6e
topology: v6e:2x2x1
jax: 0.10.0
libtpu: 0.0.40
codegen_flags: <defaults>
</compile_context>

<pallas_src>
import functools

import jax
import jax.numpy as jnp
from jax.experimental import pallas as pl
from jax.experimental.pallas import tpu as pltpu

LANE = 128
SUBLANE = 8


def _round_up(x, m):
    return (x + m - 1) // m * m


def _cdiv(a, b):
    return -(-a // b)


def _gelu(x):
    # TODO(synk): PyTorch nn.GELU default is erf-exact; tanh-approx GELU is used
    # here for robust Mosaic lowering (max abs diff ~1e-3).
    return jax.nn.gelu(x, approximate=True)


def _pad2(w, rows, cols, dtype):
    return jnp.pad(w, ((0, rows - w.shape[0]), (0, cols - w.shape[1]))).astype(dtype)


@functools.lru_cache(maxsize=1)
def _tpu_config():
    """Generation-aware knobs (trace-time only; all values are Python scalars)."""
    kind = ""
    try:
        kind = jax.devices()[0].device_kind.lower()
    except Exception:
        pass
    is_v7 = ("v7" in kind) or ("7x" in kind)
    is_v6 = "v6" in kind
    vmem_cap = None
    try:
        vmem_cap = int(getattr(pltpu.get_tpu_info(), "vmem_capacity_bytes"))
    except Exception:
        vmem_cap = None
    if not vmem_cap or vmem_cap <= 0:
        vmem_cap = (64 if is_v7 else 128) * 1024 * 1024
    # v5e/v6e (128 MiB) -> 96 MiB limit; v7x (64 MiB) -> 48 MiB limit.
    vmem_limit = min(vmem_cap * 3 // 4, 100 * 1024 * 1024)
    return dict(
        vmem_limit=int(vmem_limit),
        target_rows=1024 if is_v7 else 2048,     # rows_per_block target
        multi_core=is_v7 or ("v4" in kind),      # >1 TC sharing the grid
        gelu_bf16=is_v6 or is_v7,                # bf16 VPU/EUP available
        x_buffers=3 if is_v6 else 2,             # deeper x pipeline on v6e
    )


def _compiler_params(vmem_limit):
    return pltpu.CompilerParams(
        dimension_semantics=("parallel",),       # image/batch axis -> both TCs
        vmem_limit_bytes=int(vmem_limit))


# ----------------------------------------------------------------------------
# Fused dual-encoder kernel.
#   x_ref     : (tb*P, Cpp)   bf16  patch rows for tb images (read once)
#   we_ref    : (Cpp, 2*Dp)   bf16  [target | online] patch-embed weights
#   be_ref    : (1, 2*Dp)     f32   [target | online] patch-embed biases
#   wh_*/bh_* : head weights/biases per encoder
#   outputs   : (tb, Dp) f32 target, (tb, Dp) f32 online, (tb, Dp) bf16 target
# ----------------------------------------------------------------------------
def _dual_encoder_kernel(x_ref, we_ref, be_ref, wh_t_ref, bh_t_ref,
                         wh_o_ref, bh_o_ref, zt_ref, zo_ref, ztb_ref,
                         *, n_patches, dp, inv_p, gelu_bf16):
    x = x_ref[...]                                        # (tb*P, Cpp) bf16
    # Fused patch-embed for target + online: N = 2*Dp fills the 256-wide MXU.
    h = jnp.dot(x, we_ref[...], preferred_element_type=jnp.float32) + be_ref[...]
    if gelu_bf16:                                         # v6e/v7x: bf16 VPU/EUP
        h = _gelu(h.astype(jnp.bfloat16))
    else:                                                 # v5e: f32 elementwise
        h = _gelu(h)
    tb = x.shape[0] // n_patches
    # Mean-pool over patches as a sublane reduction (VPU/XLU, not MXU),
    # accumulated in f32; reshape keeps the lane dim unchanged.
    h3 = h.astype(jnp.float32).reshape(tb, n_patches, 2 * dp)
    pooled = (jnp.sum(h3, axis=1) * inv_p).astype(jnp.bfloat16)   # (tb, 2*Dp)
    # 128-aligned static lane split back into the two encoders, then heads.
    zt = (jnp.dot(pooled[:, :dp], wh_t_ref[...],
                  preferred_element_type=jnp.float32) + bh_t_ref[...])
    zo = (jnp.dot(pooled[:, dp:], wh_o_ref[...],
                  preferred_element_type=jnp.float32) + bh_o_ref[...])
    zt_ref[...] = zt
    zo_ref[...] = zo
    ztb_ref[...] = zt.astype(jnp.bfloat16)   # lane-dense bf16 copy for predictor


def dual_encoder_forward(x_rows, we_cat, be_cat, wh_t, bh_t, wh_o, bh_o, *,
                         n_img_pad, tb, n_patches, dp, cfg):
    rows_per_blk = tb * n_patches
    cpp = x_rows.shape[1]
    grid = (n_img_pad // tb,)

    x_spec = pl.BlockSpec((rows_per_blk, cpp), lambda i: (i, 0))
    if cfg["x_buffers"] != 2:
        try:   # deeper input pipelining on v6e (x stream near HBM roofline)
            x_spec = pl.BlockSpec((rows_per_blk, cpp), lambda i: (i, 0),
                                  pipeline_mode=pl.Buffered(cfg["x_buffers"]))
        except Exception:
            pass

    def wspec(arr):
        # Weights stay resident across the grid (index_map -> (0, 0)).
        # TODO(synk): could also single-buffer these via pl.Buffered(1) to free
        # extra VMEM on v7x.
        return pl.BlockSpec(arr.shape, lambda i: (0, 0))

    total_rows = n_img_pad * n_patches
    flops = (2 * total_rows * cpp * (2 * dp)          # fused patch embed
             + 2 * 2 * n_img_pad * dp * dp            # two heads
             + total_rows * 2 * dp)                   # pooling adds (VPU)
    transcendentals = total_rows * 2 * dp
    bytes_accessed = (x_rows.size * 2
                      + (we_cat.size + wh_t.size + wh_o.size) * 2
                      + (be_cat.size + bh_t.size + bh_o.size) * 4
                      + n_img_pad * dp * (4 + 4 + 2))

    return pl.pallas_call(
        functools.partial(_dual_encoder_kernel, n_patches=n_patches, dp=dp,
                          inv_p=1.0 / n_patches, gelu_bf16=cfg["gelu_bf16"]),
        out_shape=(jax.ShapeDtypeStruct((n_img_pad, dp), jnp.float32),
                   jax.ShapeDtypeStruct((n_img_pad, dp), jnp.float32),
                   jax.ShapeDtypeStruct((n_img_pad, dp), jnp.bfloat16)),
        grid_spec=pltpu.PrefetchScalarGridSpec(
            num_scalar_prefetch=0,
            grid=grid,
            in_specs=[x_spec,
                      wspec(we_cat), wspec(be_cat),
                      wspec(wh_t), wspec(bh_t),
                      wspec(wh_o), wspec(bh_o)],
            out_specs=[pl.BlockSpec((tb, dp), lambda i: (i, 0)),
                       pl.BlockSpec((tb, dp), lambda i: (i, 0)),
                       pl.BlockSpec((tb, dp), lambda i: (i, 0))],
        ),
        compiler_params=_compiler_params(cfg["vmem_limit"]),
        cost_estimate=pl.CostEstimate(flops=flops,
                                      transcendentals=transcendentals,
                                      bytes_accessed=bytes_accessed),
    )(x_rows, we_cat, be_cat, wh_t, bh_t, wh_o, bh_o)


# ----------------------------------------------------------------------------
# Predictor kernel: continuous action embedding (Linear) + single-hidden GELU
# MLP.  torch.cat([z, a_emb], -1) @ W1 is realized as z @ W1[:D] + a_emb @ W1[D:]
# (identical split matmul, no lane-axis concat).  All lane dims 128-padded.
# ----------------------------------------------------------------------------
def _predictor_kernel(z_ref, a_ref, wa_ref, ba_ref, w1z_ref, w1a_ref, b1_ref,
                      w2_ref, b2_ref, out_ref, *, gelu_bf16):
    a_emb = (jnp.dot(a_ref[...], wa_ref[...],
                     preferred_element_type=jnp.float32) + ba_ref[...])
    h = (jnp.dot(z_ref[...], w1z_ref[...], preferred_element_type=jnp.float32)
         + jnp.dot(a_emb.astype(jnp.bfloat16), w1a_ref[...],
                   preferred_element_type=jnp.float32)
         + b1_ref[...])
    h = _gelu(h.astype(jnp.bfloat16)) if gelu_bf16 else _gelu(h)
    pred = (jnp.dot(h.astype(jnp.bfloat16), w2_ref[...],
                    preferred_element_type=jnp.float32) + b2_ref[...])
    out_ref[...] = pred.astype(out_ref.dtype)


def predictor_forward(z, action, pp, *, n_rows, tbp, cfg):
    dp = pp["w2"].shape[1]
    ap, ep = pp["wa"].shape
    hp = pp["w1z"].shape[1]
    grid = (n_rows // tbp,)

    def wspec(arr):
        return pl.BlockSpec(arr.shape, lambda i: (0, 0))

    flops = 2 * n_rows * (ap * ep + dp * hp + ep * hp + hp * dp)
    bytes_accessed = (z.size * 2 + action.size * 2
                      + (ap * ep + dp * hp + ep * hp + hp * dp) * 2
                      + (ep + hp + dp) * 4 + n_rows * dp * 4)

    return pl.pallas_call(
        functools.partial(_predictor_kernel, gelu_bf16=cfg["gelu_bf16"]),
        out_shape=jax.ShapeDtypeStruct((n_rows, dp), jnp.float32),
        grid_spec=pltpu.PrefetchScalarGridSpec(
            num_scalar_prefetch=0,
            grid=grid,
            in_specs=[pl.BlockSpec((tbp, dp), lambda i: (i, 0)),
                      pl.BlockSpec((tbp, ap), lambda i: (i, 0)),
                      wspec(pp["wa"]), wspec(pp["ba"]),
                      wspec(pp["w1z"]), wspec(pp["w1a"]),
                      wspec(pp["b1"]), wspec(pp["w2"]), wspec(pp["b2"])],
            out_specs=pl.BlockSpec((tbp, dp), lambda i: (i, 0)),
        ),
        compiler_params=_compiler_params(cfg["vmem_limit"]),
        cost_estimate=pl.CostEstimate(flops=flops, transcendentals=n_rows * hp,
                                      bytes_accessed=bytes_accessed),
    )(z, action, pp["wa"], pp["ba"], pp["w1z"], pp["w1a"], pp["b1"],
      pp["w2"], pp["b2"])


# ----------------------------------------------------------------------------
# Glue: NCHW -> (B, num_patches, C*ph*pw)   (bf16 in, bf16 out)
# ----------------------------------------------------------------------------
def patchify(x, patch):
    B, C, H, W = x.shape
    Hp, Wp = H // patch, W // patch
    x = x.reshape(B, C, Hp, patch, Wp, patch)
    x = x.transpose(0, 2, 4, 1, 3, 5)            # (B, Hp, Wp, C, ph, pw)
    return x.reshape(B, Hp * Wp, C * patch * patch)


# ----------------------------------------------------------------------------
# Parameter init (deterministic, synthetic, logical shapes).  Target encoder
# weights are copies of the online encoder weights, mirroring
# _copy_weights_to_target_encoder().
# ----------------------------------------------------------------------------
def init_jepa_params(key, *, input_channels, patch_size, latent_dim,
                     action_dim, action_emb_dim, predictor_hidden_dim):
    Cp = input_channels * patch_size * patch_size
    ks = jax.random.split(key, 5)

    def w(k, shape):
        return 0.02 * jax.random.normal(k, shape, jnp.float32)

    online = dict(
        we=w(ks[0], (Cp, latent_dim)),
        be=jnp.zeros((1, latent_dim), jnp.float32),
        wh=w(ks[1], (latent_dim, latent_dim)),
        bh=jnp.zeros((1, latent_dim), jnp.float32),
    )
    target = jax.tree_util.tree_map(lambda a: a + 0.0, online)  # weight copy

    w1 = w(ks[2], (latent_dim + action_emb_dim, predictor_hidden_dim))
    return dict(
        online_encoder=online,
        target_encoder=target,
        wa=w(ks[3], (action_dim, action_emb_dim)),
        ba=jnp.zeros((1, action_emb_dim), jnp.float32),
        w1z=w1[:latent_dim],
        w1a=w1[latent_dim:],
        b1=jnp.zeros((1, predictor_hidden_dim), jnp.float32),
        w2=w(ks[4], (predictor_hidden_dim, latent_dim)),
        b2=jnp.zeros((1, latent_dim), jnp.float32),
    )


# ----------------------------------------------------------------------------
# JEPA.forward  (target_encoder_mode='default', action_type='continuous')
# ----------------------------------------------------------------------------
@functools.partial(jax.jit, static_argnames=("patch_size",))
def jepa_forward(params, s_t, action, s_t_plus_1, patch_size):
    cfg = _tpu_config()
    B, C, H, W = s_t.shape
    P = (H // patch_size) * (W // patch_size)
    Cp = C * patch_size * patch_size
    latent_dim = params["online_encoder"]["we"].shape[1]
    action_dim = params["wa"].shape[0]
    emb_dim = params["wa"].shape[1]
    hidden_dim = params["w1z"].shape[1]

    Cpp = _round_up(Cp, LANE)
    Dp = _round_up(latent_dim, LANE)
    Ap = _round_up(action_dim, LANE)
    Ep = _round_up(emb_dim, LANE)
    Hp = _round_up(hidden_dim, LANE)

    # -- lane-dense (zero-padded) parameter slabs; bf16 weights for the MXU.
    def pad_enc(ep_):
        return dict(we=_pad2(ep_["we"], Cpp, Dp, jnp.bfloat16),
                    be=_pad2(ep_["be"], 1, Dp, jnp.float32),
                    wh=_pad2(ep_["wh"], Dp, Dp, jnp.bfloat16),
                    bh=_pad2(ep_["bh"], 1, Dp, jnp.float32))

    tgt = pad_enc(params["target_encoder"])
    onl = pad_enc(params["online_encoder"])
    # MXU-fill fusion: both encoders share one patch-embed matmul (N = 2*Dp).
    we_cat = jnp.concatenate([tgt["we"], onl["we"]], axis=1)   # (Cpp, 2*Dp)
    be_cat = jnp.concatenate([tgt["be"], onl["be"]], axis=1)   # (1, 2*Dp)

    pp = dict(wa=_pad2(params["wa"], Ap, Ep, jnp.bfloat16),
              ba=_pad2(params["ba"], 1, Ep, jnp.float32),
              w1z=_pad2(params["w1z"], Dp, Hp, jnp.bfloat16),
              w1a=_pad2(params["w1a"], Ep, Hp, jnp.bfloat16),
              b1=_pad2(params["b1"], 1, Hp, jnp.float32),
              w2=_pad2(params["w2"], Hp, Dp, jnp.bfloat16),
              b2=_pad2(params["b2"], 1, Dp, jnp.float32))

    # -- patchify both frames in bf16 (halves XLA-side transpose/concat/pad
    #    bytes) and stack along the image axis; the encoder kernel reads each
    #    patch row from HBM exactly once for both encoders.
    x_all = jnp.concatenate(
        [patchify(s_t.astype(jnp.bfloat16), patch_size),
         patchify(s_t_plus_1.astype(jnp.bfloat16), patch_size)], axis=0)

    n_img = 2 * B
    # -- generation-aware tile size: VMEM budget per image (x stream + f32 h
    #    intermediate, with slack) plus resident weights, capped by the
    #    rows-per-block target for this chip generation.
    bytes_per_img = P * Cpp * 2 * cfg["x_buffers"] + P * (2 * Dp) * 4 * 2
    fixed_bytes = 2 * 2 * (Cpp * 2 * Dp + 2 * Dp * Dp) + 2 * 4 * 4 * 2 * Dp
    budget = int(cfg["vmem_limit"] * 0.8) - fixed_bytes
    imgs_fit = max(budget, 0) // bytes_per_img
    tb_budget = max(SUBLANE, (imgs_fit // SUBLANE) * SUBLANE)
    tb_target = max(SUBLANE, _round_up(max(1, cfg["target_rows"] // P), SUBLANE))
    tb = max(SUBLANE, min(tb_target, tb_budget, _round_up(n_img, SUBLANE)))
    # v7x / megacore: make sure the "parallel" image grid has >= 2 steps.
    if cfg["multi_core"]:
        half = _round_up(_cdiv(n_img, 2), SUBLANE)
        if SUBLANE <= half < tb:
            tb = half
    n_img_pad = _round_up(n_img, tb)
    # TODO(synk): for extreme patch counts where even tb == 8 images exceeds the
    # VMEM budget, add a second "arbitrary" grid axis over patch chunks that
    # accumulates the pooled sum (pl.when init on chunk 0, heads on last chunk).

    x_all = jnp.pad(x_all, ((0, n_img_pad - n_img), (0, 0), (0, Cpp - Cp)))
    x_rows = x_all.reshape(n_img_pad * P, Cpp)   # 2-D bf16, no in-kernel reshape of x

    z_t_full, z_o_full, z_t_bf16 = dual_encoder_forward(
        x_rows, we_cat, be_cat, tgt["wh"], tgt["bh"], onl["wh"], onl["bh"],
        n_img_pad=n_img_pad, tb=tb, n_patches=P, dp=Dp, cfg=cfg)

    # torch.no_grad() + .detach()  ≙  stop_gradient
    z_t_full = jax.lax.stop_gradient(z_t_full)
    z_t_bf16 = jax.lax.stop_gradient(z_t_bf16)

    target_for_predictor = z_t_full[B:2 * B, :latent_dim]
    online_s_t_representation = z_o_full[:B, :latent_dim]
    online_s_t_plus_1_representation = z_o_full[B:2 * B, :latent_dim]

    # -- predictor consumes the encoder's lane-dense bf16 target encodings
    #    directly (no XLA pad/cast of z).  It runs over all n_img_pad rows
    #    (rows >= B are discarded); actions are zero-padded to match.
    tbp = n_img_pad if n_img_pad <= 512 else (512 if n_img_pad % 512 == 0 else tb)
    if (cfg["multi_core"] and tbp == n_img_pad and n_img_pad >= 2 * SUBLANE
            and (n_img_pad // 2) % SUBLANE == 0):
        tbp = n_img_pad // 2
    a_in = jnp.pad(action.astype(jnp.bfloat16),
                   ((0, n_img_pad - B), (0, Ap - action_dim)))

    pred_full = predictor_forward(z_t_bf16, a_in, pp,
                                  n_rows=n_img_pad, tbp=tbp, cfg=cfg)
    predicted_s_t_plus_1_embedding = pred_full[:B, :latent_dim]

    return (predicted_s_t_plus_1_embedding, target_for_predictor,
            online_s_t_representation, online_s_t_plus_1_representation)


if __name__ == "__main__":
    B, C, H, W = 2, 4, 16, 16
    patch_size = 4
    latent_dim = 32
    action_dim = 6
    action_emb_dim = 16
    predictor_hidden_dim = 64

    key = jax.random.PRNGKey(0)
    k_param, k_s, k_s1, k_a = jax.random.split(key, 4)
    params = init_jepa_params(
        k_param, input_channels=C, patch_size=patch_size, latent_dim=latent_dim,
        action_dim=action_dim, action_emb_dim=action_emb_dim,
        predictor_hidden_dim=predictor_hidden_dim)

    s_t = jax.random.normal(k_s, (B, C, H, W), jnp.float32)
    s_t_plus_1 = jax.random.normal(k_s1, (B, C, H, W), jnp.float32)
    action = jax.random.normal(k_a, (B, action_dim), jnp.float32)  # continuous

    outs = jax.block_until_ready(
        jepa_forward(params, s_t, action, s_t_plus_1, patch_size))
    pred, tgt, on_t, on_tp1 = outs
    assert pred.shape == (B, latent_dim)
    assert tgt.shape == (B, latent_dim)
    assert on_t.shape == (B, latent_dim)
    assert on_tp1.shape == (B, latent_dim)
    # target encoder == online encoder at init (weights copied); both paths run
    # through the identical fused-kernel math, so their outputs must match:
    assert jnp.allclose(tgt, on_tp1, atol=1e-5)
    print("KERNEL_OK")
</pallas_src>

<mosaic_0001>
module attributes {stable_mosaic.version = 11 : i64} {
  func.func @_dual_encoder_kernel(%arg0: i32, %arg1: memref<128x128xbf16, #tpu.memory_space<vmem>>, %arg2: memref<128x256xbf16, #tpu.memory_space<vmem>>, %arg3: memref<1x256xf32, #tpu.memory_space<vmem>>, %arg4: memref<128x128xbf16, #tpu.memory_space<vmem>>, %arg5: memref<1x128xf32, #tpu.memory_space<vmem>>, %arg6: memref<128x128xbf16, #tpu.memory_space<vmem>>, %arg7: memref<1x128xf32, #tpu.memory_space<vmem>>, %arg8: memref<8x128xf32, #tpu.memory_space<vmem>>, %arg9: memref<8x128xf32, #tpu.memory_space<vmem>>, %arg10: memref<8x128xbf16, #tpu.memory_space<vmem>>) attributes {dimension_semantics = [#tpu.dimension_semantics<parallel>], iteration_bounds = array<i64: 1>, scalar_prefetch = 0 : i64, scratch_operands = 0 : i64, tpu.core_type = #tpu.core_type<tc>, window_params = [{transform_indices = @transform_0, window_bounds = array<i64: 128, 128>}, {pipeline_mode = #tpu.pipeline_mode<synchronous>, transform_indices = @transform_1, window_bounds = array<i64: 128, 256>}, {pipeline_mode = #tpu.pipeline_mode<synchronous>, transform_indices = @transform_2, window_bounds = array<i64: 1, 256>}, {pipeline_mode = #tpu.pipeline_mode<synchronous>, transform_indices = @transform_3, window_bounds = array<i64: 128, 128>}, {pipeline_mode = #tpu.pipeline_mode<synchronous>, transform_indices = @transform_4, window_bounds = array<i64: 1, 128>}, {pipeline_mode = #tpu.pipeline_mode<synchronous>, transform_indices = @transform_5, window_bounds = array<i64: 128, 128>}, {pipeline_mode = #tpu.pipeline_mode<synchronous>, transform_indices = @transform_6, window_bounds = array<i64: 1, 128>}, {transform_indices = @transform_7, window_bounds = array<i64: 8, 128>}, {transform_indices = @transform_8, window_bounds = array<i64: 8, 128>}, {transform_indices = @transform_9, window_bounds = array<i64: 8, 128>}]} {
    %c0 = arith.constant 0 : index
    %c0_0 = arith.constant 0 : index
    %0 = vector.load %arg1[%c0, %c0_0] : memref<128x128xbf16, #tpu.memory_space<vmem>>, vector<128x128xbf16>
    %c0_1 = arith.constant 0 : index
    %c0_2 = arith.constant 0 : index
    %1 = vector.load %arg2[%c0_1, %c0_2] : memref<128x256xbf16, #tpu.memory_space<vmem>>, vector<128x256xbf16>
    %cst = arith.constant dense<0.000000e+00> : vector<128x256xf32>
    %2 = tpu.matmul %0, %1, %cst {dimension_numbers = #tpu.dot_dimension_numbers<[1], [0], [0], [1], [0, 0, 1, 1], [], []>} : vector<128x128xbf16>, vector<128x256xbf16>, vector<128x256xf32> -> vector<128x256xf32>
    %c0_3 = arith.constant 0 : index
    %c0_4 = arith.constant 0 : index
    %3 = vector.load %arg3[%c0_3, %c0_4] : memref<1x256xf32, #tpu.memory_space<vmem>>, vector<1x256xf32>
    %4 = vector.broadcast %3 : vector<1x256xf32> to vector<128x256xf32>
    %5 = arith.addf %2, %4 : vector<128x256xf32>
    %6 = arith.mulf %5, %5 : vector<128x256xf32>
    %7 = arith.mulf %5, %6 : vector<128x256xf32>
    %cst_5 = arith.constant 4.471500e-02 : f32
    %8 = vector.broadcast %cst_5 : f32 to vector<128x256xf32>
    %9 = arith.mulf %8, %7 : vector<128x256xf32>
    %10 = arith.addf %5, %9 : vector<128x256xf32>
    %cst_6 = arith.constant 0.797884583 : f32
    %11 = vector.broadcast %cst_6 : f32 to vector<128x256xf32>
    %12 = arith.mulf %11, %10 : vector<128x256xf32>
    %13 = math.tanh %12 : vector<128x256xf32>
    %cst_7 = arith.constant 1.000000e+00 : f32
    %14 = vector.broadcast %cst_7 : f32 to vector<128x256xf32>
    %15 = arith.addf %14, %13 : vector<128x256xf32>
    %cst_8 = arith.constant 5.000000e-01 : f32
    %16 = vector.broadcast %cst_8 : f32 to vector<128x256xf32>
    %17 = arith.mulf %16, %15 : vector<128x256xf32>
    %18 = arith.mulf %5, %17 : vector<128x256xf32>
    %19 = vector.shape_cast %18 : vector<128x256xf32> to vector<8x16x256xf32>
    %cst_9 = arith.constant dense<0.000000e+00> : vector<8x256xf32>
    %20 = vector.multi_reduction <add>, %19, %cst_9 [1] : vector<8x16x256xf32> to vector<8x256xf32>
    %cst_10 = arith.constant 6.250000e-02 : f32
    %21 = vector.broadcast %cst_10 : f32 to vector<8x256xf32>
    %22 = arith.mulf %20, %21 : vector<8x256xf32>
    %23 = arith.truncf %22 : vector<8x256xf32> to vector<8x256xbf16>
    %24 = vector.extract_strided_slice %23 {offsets = [0, 0], sizes = [8, 128], strides = [1, 1]} : vector<8x256xbf16> to vector<8x128xbf16>
    %c0_11 = arith.constant 0 : index
    %c0_12 = arith.constant 0 : index
    %25 = vector.load %arg4[%c0_11, %c0_12] : memref<128x128xbf16, #tpu.memory_space<vmem>>, vector<128x128xbf16>
    %cst_13 = arith.constant dense<0.000000e+00> : vector<8x128xf32>
    %26 = tpu.matmul %24, %25, %cst_13 {dimension_numbers = #tpu.dot_dimension_numbers<[1], [0], [0], [1], [0, 0, 1, 1], [], []>} : vector<8x128xbf16>, vector<128x128xbf16>, vector<8x128xf32> -> vector<8x128xf32>
    %c0_14 = arith.constant 0 : index
    %c0_15 = arith.constant 0 : index
    %27 = vector.load %arg5[%c0_14, %c0_15] : memref<1x128xf32, #tpu.memory_space<vmem>>, vector<1x128xf32>
    %28 = vector.broadcast %27 : vector<1x128xf32> to vector<8x128xf32>
    %29 = arith.addf %26, %28 : vector<8x128xf32>
    %30 = vector.extract_strided_slice %23 {offsets = [0, 128], sizes = [8, 128], strides = [1, 1]} : vector<8x256xbf16> to vector<8x128xbf16>
    %c0_16 = arith.constant 0 : index
    %c0_17 = arith.constant 0 : index
    %31 = vector.load %arg6[%c0_16, %c0_17] : memref<128x128xbf16, #tpu.memory_space<vmem>>, vector<128x128xbf16>
    %cst_18 = arith.constant dense<0.000000e+00> : vector<8x128xf32>
    %32 = tpu.matmul %30, %31, %cst_18 {dimension_numbers = #tpu.dot_dimension_numbers<[1], [0], [0], [1], [0, 0, 1, 1], [], []>} : vector<8x128xbf16>, vector<128x128xbf16>, vector<8x128xf32> -> vector<8x128xf32>
    %c0_19 = arith.constant 0 : index
    %c0_20 = arith.constant 0 : index
    %33 = vector.load %arg7[%c0_19, %c0_20] : memref<1x128xf32, #tpu.memory_space<vmem>>, vector<1x128xf32>
    %34 = vector.broadcast %33 : vector<1x128xf32> to vector<8x128xf32>
    %35 = arith.addf %32, %34 : vector<8x128xf32>
    %c0_21 = arith.constant 0 : index
    %c0_22 = arith.constant 0 : index
    %36 = vector.load %arg8[%c0_21, %c0_22] : memref<8x128xf32, #tpu.memory_space<vmem>>, vector<8x128xf32>
    tpu.vector_store %arg8[%c0_21, %c0_22], %29 {strides = array<i32>} : memref<8x128xf32, #tpu.memory_space<vmem>>, vector<8x128xf32>,
    %c0_23 = arith.constant 0 : index
    %c0_24 = arith.constant 0 : index
    %37 = vector.load %arg9[%c0_23, %c0_24] : memref<8x128xf32, #tpu.memory_space<vmem>>, vector<8x128xf32>
    tpu.vector_store %arg9[%c0_23, %c0_24], %35 {strides = array<i32>} : memref<8x128xf32, #tpu.memory_space<vmem>>, vector<8x128xf32>,
    %38 = arith.truncf %29 : vector<8x128xf32> to vector<8x128xbf16>
    %c0_25 = arith.constant 0 : index
    %c0_26 = arith.constant 0 : index
    %39 = vector.load %arg10[%c0_25, %c0_26] : memref<8x128xbf16, #tpu.memory_space<vmem>>, vector<8x128xbf16>
    tpu.vector_store %arg10[%c0_25, %c0_26], %38 {strides = array<i32>} : memref<8x128xbf16, #tpu.memory_space<vmem>>, vector<8x128xbf16>,
    return
  }
  func.func @transform_0(%arg0: i32) -> (i32, i32) {
    %c0_i32 = arith.constant 0 : i32
    %c0_i32_0 = arith.constant 0 : i32
    return %arg0, %c0_i32 : i32, i32
  }
  func.func @transform_1(%arg0: i32) -> (i32, i32) {
    %c0_i32 = arith.constant 0 : i32
    %c0_i32_0 = arith.constant 0 : i32
    %c0_i32_1 = arith.constant 0 : i32
    return %c0_i32, %c0_i32_0 : i32, i32
  }
  func.func @transform_2(%arg0: i32) -> (i32, i32) {
    %c0_i32 = arith.constant 0 : i32
    %c0_i32_0 = arith.constant 0 : i32
    %c0_i32_1 = arith.constant 0 : i32
    return %c0_i32, %c0_i32_0 : i32, i32
  }
  func.func @transform_3(%arg0: i32) -> (i32, i32) {
    %c0_i32 = arith.constant 0 : i32
    %c0_i32_0 = arith.constant 0 : i32
    %c0_i32_1 = arith.constant 0 : i32
    return %c0_i32, %c0_i32_0 : i32, i32
  }
  func.func @transform_4(%arg0: i32) -> (i32, i32) {
    %c0_i32 = arith.constant 0 : i32
    %c0_i32_0 = arith.constant 0 : i32
    %c0_i32_1 = arith.constant 0 : i32
    return %c0_i32, %c0_i32_0 : i32, i32
  }
  func.func @transform_5(%arg0: i32) -> (i32, i32) {
    %c0_i32 = arith.constant 0 : i32
    %c0_i32_0 = arith.constant 0 : i32
    %c0_i32_1 = arith.constant 0 : i32
    return %c0_i32, %c0_i32_0 : i32, i32
  }
  func.func @transform_6(%arg0: i32) -> (i32, i32) {
    %c0_i32 = arith.constant 0 : i32
    %c0_i32_0 = arith.constant 0 : i32
    %c0_i32_1 = arith.constant 0 : i32
    return %c0_i32, %c0_i32_0 : i32, i32
  }
  func.func @transform_7(%arg0: i32) -> (i32, i32) {
    %c0_i32 = arith.constant 0 : i32
    %c0_i32_0 = arith.constant 0 : i32
    return %arg0, %c0_i32 : i32, i32
  }
  func.func @transform_8(%arg0: i32) -> (i32, i32) {
    %c0_i32 = arith.constant 0 : i32
    %c0_i32_0 = arith.constant 0 : i32
    return %arg0, %c0_i32 : i32, i32
  }
  func.func @transform_9(%arg0: i32) -> (i32, i32) {
    %c0_i32 = arith.constant 0 : i32
    %c0_i32_0 = arith.constant 0 : i32
    return %arg0, %c0_i32 : i32, i32
  }
}

module attributes {stable_mosaic.version = 11 : i64} {
  func.func @_predictor_kernel(%arg0: i32, %arg1: memref<8x128xbf16, #tpu.memory_space<vmem>>, %arg2: memref<8x128xbf16, #tpu.memory_space<vmem>>, %arg3: memref<128x128xbf16, #tpu.memory_space<vmem>>, %arg4: memref<1x128xf32, #tpu.memory_space<vmem>>, %arg5: memref<128x128xbf16, #tpu.memory_space<vmem>>, %arg6: memref<128x128xbf16, #tpu.memory_space<vmem>>, %arg7: memref<1x128xf32, #tpu.memory_space<vmem>>, %arg8: memref<128x128xbf16, #tpu.memory_space<vmem>>, %arg9: memref<1x128xf32, #tpu.memory_space<vmem>>, %arg10: memref<8x128xf32, #tpu.memory_space<vmem>>) attributes {dimension_semantics = [#tpu.dimension_semantics<parallel>], iteration_bounds = array<i64: 1>, scalar_prefetch = 0 : i64, scratch_operands = 0 : i64, tpu.core_type = #tpu.core_type<tc>, window_params = [{transform_indices = @transform_0, window_bounds = array<i64: 8, 128>}, {transform_indices = @transform_1, window_bounds = array<i64: 8, 128>}, {pipeline_mode = #tpu.pipeline_mode<synchronous>, transform_indices = @transform_2, window_bounds = array<i64: 128, 128>}, {pipeline_mode = #tpu.pipeline_mode<synchronous>, transform_indices = @transform_3, window_bounds = array<i64: 1, 128>}, {pipeline_mode = #tpu.pipeline_mode<synchronous>, transform_indices = @transform_4, window_bounds = array<i64: 128, 128>}, {pipeline_mode = #tpu.pipeline_mode<synchronous>, transform_indices = @transform_5, window_bounds = array<i64: 128, 128>}, {pipeline_mode = #tpu.pipeline_mode<synchronous>, transform_indices = @transform_6, window_bounds = array<i64: 1, 128>}, {pipeline_mode = #tpu.pipeline_mode<synchronous>, transform_indices = @transform_7, window_bounds = array<i64: 128, 128>}, {pipeline_mode = #tpu.pipeline_mode<synchronous>, transform_indices = @transform_8, window_bounds = array<i64: 1, 128>}, {transform_indices = @transform_9, window_bounds = array<i64: 8, 128>}]} {
    %c0 = arith.constant 0 : index
    %c0_0 = arith.constant 0 : index
    %0 = vector.load %arg2[%c0, %c0_0] : memref<8x128xbf16, #tpu.memory_space<vmem>>, vector<8x128xbf16>
    %c0_1 = arith.constant 0 : index
    %c0_2 = arith.constant 0 : index
    %1 = vector.load %arg3[%c0_1, %c0_2] : memref<128x128xbf16, #tpu.memory_space<vmem>>, vector<128x128xbf16>
    %cst = arith.constant dense<0.000000e+00> : vector<8x128xf32>
    %2 = tpu.matmul %0, %1, %cst {dimension_numbers = #tpu.dot_dimension_numbers<[1], [0], [0], [1], [0, 0, 1, 1], [], []>} : vector<8x128xbf16>, vector<128x128xbf16>, vector<8x128xf32> -> vector<8x128xf32>
    %c0_3 = arith.constant 0 : index
    %c0_4 = arith.constant 0 : index
    %3 = vector.load %arg4[%c0_3, %c0_4] : memref<1x128xf32, #tpu.memory_space<vmem>>, vector<1x128xf32>
    %4 = vector.broadcast %3 : vector<1x128xf32> to vector<8x128xf32>
    %5 = arith.addf %2, %4 : vector<8x128xf32>
    %c0_5 = arith.constant 0 : index
    %c0_6 = arith.constant 0 : index
    %6 = vector.load %arg1[%c0_5, %c0_6] : memref<8x128xbf16, #tpu.memory_space<vmem>>, vector<8x128xbf16>
    %c0_7 = arith.constant 0 : index
    %c0_8 = arith.constant 0 : index
    %7 = vector.load %arg5[%c0_7, %c0_8] : memref<128x128xbf16, #tpu.memory_space<vmem>>, vector<128x128xbf16>
    %cst_9 = arith.constant dense<0.000000e+00> : vector<8x128xf32>
    %8 = tpu.matmul %6, %7, %cst_9 {dimension_numbers = #tpu.dot_dimension_numbers<[1], [0], [0], [1], [0, 0, 1, 1], [], []>} : vector<8x128xbf16>, vector<128x128xbf16>, vector<8x128xf32> -> vector<8x128xf32>
    %9 = arith.truncf %5 : vector<8x128xf32> to vector<8x128xbf16>
    %c0_10 = arith.constant 0 : index
    %c0_11 = arith.constant 0 : index
    %10 = vector.load %arg6[%c0_10, %c0_11] : memref<128x128xbf16, #tpu.memory_space<vmem>>, vector<128x128xbf16>
    %cst_12 = arith.constant dense<0.000000e+00> : vector<8x128xf32>
    %11 = tpu.matmul %9, %10, %cst_12 {dimension_numbers = #tpu.dot_dimension_numbers<[1], [0], [0], [1], [0, 0, 1, 1], [], []>} : vector<8x128xbf16>, vector<128x128xbf16>, vector<8x128xf32> -> vector<8x128xf32>
    %12 = arith.addf %8, %11 : vector<8x128xf32>
    %c0_13 = arith.constant 0 : index
    %c0_14 = arith.constant 0 : index
    %13 = vector.load %arg7[%c0_13, %c0_14] : memref<1x128xf32, #tpu.memory_space<vmem>>, vector<1x128xf32>
    %14 = vector.broadcast %13 : vector<1x128xf32> to vector<8x128xf32>
    %15 = arith.addf %12, %14 : vector<8x128xf32>
    %16 = arith.mulf %15, %15 : vector<8x128xf32>
    %17 = arith.mulf %15, %16 : vector<8x128xf32>
    %cst_15 = arith.constant 4.471500e-02 : f32
    %18 = vector.broadcast %cst_15 : f32 to vector<8x128xf32>
    %19 = arith.mulf %18, %17 : vector<8x128xf32>
    %20 = arith.addf %15, %19 : vector<8x128xf32>
    %cst_16 = arith.constant 0.797884583 : f32
    %21 = vector.broadcast %cst_16 : f32 to vector<8x128xf32>
    %22 = arith.mulf %21, %20 : vector<8x128xf32>
    %23 = math.tanh %22 : vector<8x128xf32>
    %cst_17 = arith.constant 1.000000e+00 : f32
    %24 = vector.broadcast %cst_17 : f32 to vector<8x128xf32>
    %25 = arith.addf %24, %23 : vector<8x128xf32>
    %cst_18 = arith.constant 5.000000e-01 : f32
    %26 = vector.broadcast %cst_18 : f32 to vector<8x128xf32>
    %27 = arith.mulf %26, %25 : vector<8x128xf32>
    %28 = arith.mulf %15, %27 : vector<8x128xf32>
    %29 = arith.truncf %28 : vector<8x128xf32> to vector<8x128xbf16>
    %c0_19 = arith.constant 0 : index
    %c0_20 = arith.constant 0 : index
    %30 = vector.load %arg8[%c0_19, %c0_20] : memref<128x128xbf16, #tpu.memory_space<vmem>>, vector<128x128xbf16>
    %cst_21 = arith.constant dense<0.000000e+00> : vector<8x128xf32>
    %31 = tpu.matmul %29, %30, %cst_21 {dimension_numbers = #tpu.dot_dimension_numbers<[1], [0], [0], [1], [0, 0, 1, 1], [], []>} : vector<8x128xbf16>, vector<128x128xbf16>, vector<8x128xf32> -> vector<8x128xf32>
    %c0_22 = arith.constant 0 : index
    %c0_23 = arith.constant 0 : index
    %32 = vector.load %arg9[%c0_22, %c0_23] : memref<1x128xf32, #tpu.memory_space<vmem>>, vector<1x128xf32>
    %33 = vector.broadcast %32 : vector<1x128xf32> to vector<8x128xf32>
    %34 = arith.addf %31, %33 : vector<8x128xf32>
    %c0_24 = arith.constant 0 : index
    %c0_25 = arith.constant 0 : index
    %35 = vector.load %arg10[%c0_24, %c0_25] : memref<8x128xf32, #tpu.memory_space<vmem>>, vector<8x128xf32>
    tpu.vector_store %arg10[%c0_24, %c0_25], %34 {strides = array<i32>} : memref<8x128xf32, #tpu.memory_space<vmem>>, vector<8x128xf32>,
    return
  }
  func.func @transform_0(%arg0: i32) -> (i32, i32) {
    %c0_i32 = arith.constant 0 : i32
    %c0_i32_0 = arith.constant 0 : i32
    return %arg0, %c0_i32 : i32, i32
  }
  func.func @transform_1(%arg0: i32) -> (i32, i32) {
    %c0_i32 = arith.constant 0 : i32
    %c0_i32_0 = arith.constant 0 : i32
    return %arg0, %c0_i32 : i32, i32
  }
  func.func @transform_2(%arg0: i32) -> (i32, i32) {
    %c0_i32 = arith.constant 0 : i32
    %c0_i32_0 = arith.constant 0 : i32
    %c0_i32_1 = arith.constant 0 : i32
    return %c0_i32, %c0_i32_0 : i32, i32
  }
  func.func @transform_3(%arg0: i32) -> (i32, i32) {
    %c0_i32 = arith.constant 0 : i32
    %c0_i32_0 = arith.constant 0 : i32
    %c0_i32_1 = arith.constant 0 : i32
    return %c0_i32, %c0_i32_0 : i32, i32
  }
  func.func @transform_4(%arg0: i32) -> (i32, i32) {
    %c0_i32 = arith.constant 0 : i32
    %c0_i32_0 = arith.constant 0 : i32
    %c0_i32_1 = arith.constant 0 : i32
    return %c0_i32, %c0_i32_0 : i32, i32
  }
  func.func @transform_5(%arg0: i32) -> (i32, i32) {
    %c0_i32 = arith.constant 0 : i32
    %c0_i32_0 = arith.constant 0 : i32
    %c0_i32_1 = arith.constant 0 : i32
    return %c0_i32, %c0_i32_0 : i32, i32
  }
  func.func @transform_6(%arg0: i32) -> (i32, i32) {
    %c0_i32 = arith.constant 0 : i32
    %c0_i32_0 = arith.constant 0 : i32
    %c0_i32_1 = arith.constant 0 : i32
    return %c0_i32, %c0_i32_0 : i32, i32
  }
  func.func @transform_7(%arg0: i32) -> (i32, i32) {
    %c0_i32 = arith.constant 0 : i32
    %c0_i32_0 = arith.constant 0 : i32
    %c0_i32_1 = arith.constant 0 : i32
    return %c0_i32, %c0_i32_0 : i32, i32
  }
  func.func @transform_8(%arg0: i32) -> (i32, i32) {
    %c0_i32 = arith.constant 0 : i32
    %c0_i32_0 = arith.constant 0 : i32
    %c0_i32_1 = arith.constant 0 : i32
    return %c0_i32, %c0_i32_0 : i32, i32
  }
  func.func @transform_9(%arg0: i32) -> (i32, i32) {
    %c0_i32 = arith.constant 0 : i32
    %c0_i32_0 = arith.constant 0 : i32
    return %arg0, %c0_i32 : i32, i32
  }
}

</mosaic_0001>

<bundles_post_ra>
// kernel: jepa_forward.3
= control target key start
LH: loop header
LB: loop body
LE: loop exit
PB: predicated region body
PF: predicated region fallthrough
CT: control target
= control target key end

     0   :  { %v676_v0 = vmov 0.0   ;;  %vm677_vm0 = vmmov 0   ;;  %s882_s2 = inlined_call_operand.vmem [shape: bf16[128,128], index: 2, kind: input, shape index: {}]   ;;  %s883_s4 = inlined_call_operand.vmem [shape: bf16[128,128], index: 4, kind: input, shape index: {}]   ;;  %s884_s5 = inlined_call_operand.vmem [shape: bf16[128,128], index: 5, kind: input, shape index: {}]   ;;  %s885_s1 = inlined_call_operand.vmem [shape: bf16[8,128], index: 1, kind: input, shape index: {}]   ;;  %s886_s0 = inlined_call_operand.vmem [shape: bf16[8,128], index: 0, kind: input, shape index: {}]   ;;  %s887_s3 = inlined_call_operand.vmem [shape: f32[1,128], index: 3, kind: input, shape index: {}]   ;;  %s888_s7 = inlined_call_operand.vmem [shape: bf16[128,128], index: 7, kind: input, shape index: {}]   ;;  %s889_s6 = inlined_call_operand.vmem [shape: f32[1,128], index: 6, kind: input, shape index: {}]   ;;  %s890_s8 = inlined_call_operand.vmem [shape: f32[1,128], index: 8, kind: input, shape index: {}]   ;;  %s891_s9 = inlined_call_operand.vmem [shape: f32[8,128], index: 9, kind: output, shape index: {}]  }
   0x1   :  { %560 = vmatprep.subr.bf16.mxu0 %v676_v0  ;;  %v642_v1 = vld [vmem:[%s882_s2 + $0x38] sm:$0xff]   ;;  %576 = vmatprep.mubr.msk.bf16.mxu0 %vm677_vm0, %v676_v0  ;;  %v643_v2 = vld [vmem:[%s882_s2 + $0x30] sm:$0xff]   ;;  %v644_v3 = vld [vmem:[%s882_s2 + $0x28] sm:$0xff]  }
   0x2   :  { %580 = vmatprep.subr.bf16.mxu1 %v676_v0  ;;  %596 = vmatprep.mubr.msk.bf16.mxu1 %vm677_vm0, %v676_v0  ;;  %v645_v4 = vld [vmem:[%s882_s2 + $0x20] sm:$0xff]   ;;  %v652_v5 = vld [vmem:[%s884_s5 + $0x38] sm:$0xff]   ;;  %v654_v6 = vld [vmem:[%s884_s5 + $0x30] sm:$0xff]  }
   0x3   :  { %561 = vmatpush3.bf16.msra.mxu0 %v642_v1  ;;  %581 = vmatpush3.bf16.msra.mxu1 %v652_v5  ;;  %v646_v7 = vld [vmem:[%s882_s2 + $0x18] sm:$0xff]   ;;  %v656_v8 = vld [vmem:[%s884_s5 + $0x28] sm:$0xff]   ;;  %v647_v9 = vld [vmem:[%s882_s2 + $0x10] sm:$0xff]  }
   0x4   :  { %562 = vmatprep.subr.bf16.mxu0 %v676_v0  ;;  %582 = vmatprep.subr.bf16.mxu1 %v676_v0  ;;  %v658_v10 = vld [vmem:[%s884_s5 + $0x20] sm:$0xff]   ;;  %v648_v11 = vld [vmem:[%s882_s2 + $0x8] sm:$0xff]   ;;  %v660_v12 = vld [vmem:[%s884_s5 + $0x18] sm:$0xff]  }
   0x5   :  { %v649_v13 = vld [vmem:[%s882_s2] sm:$0xff]   ;;  %v662_v14 = vld [vmem:[%s884_s5 + $0x10] sm:$0xff]   ;;  %v650_v16 = vld [vmem:[%s883_s4 + $0x38] sm:$0xff]  }
   0x6   :  { %v33_v15 = vld [vmem:[%s885_s1] sm:$0xf]  ;;  %v664_v17 = vld [vmem:[%s884_s5 + $0x8] sm:$0xff]   ;;  %v651_v18 = vld [vmem:[%s883_s4 + $0x30] sm:$0xff]  }
   0x7   :  { %563 = vmatpush3.bf16.msra.mxu0 %v643_v2  ;;  %583 = vmatpush3.bf16.msra.mxu1 %v654_v6  ;;  %v653_v19 = vld [vmem:[%s883_s4 + $0x28] sm:$0xff]   ;;  %v655_v20 = vld [vmem:[%s883_s4 + $0x20] sm:$0xff]   ;;  %v657_v21 = vld [vmem:[%s883_s4 + $0x18] sm:$0xff]  }
   0x8   :  { %564 = vmatprep.subr.bf16.mxu0 %v676_v0  ;;  %584 = vmatprep.subr.bf16.mxu1 %v676_v0  ;;  %v659_v22 = vld [vmem:[%s883_s4 + $0x10] sm:$0xff]   ;;  %v661_v23 = vld [vmem:[%s883_s4 + $0x8] sm:$0xff]   ;;  %v663_v24 = vld [vmem:[%s883_s4] sm:$0xff]  }
   0x9   :  { %v145_v25 = vld [vmem:[%s886_s0] sm:$0xf]  ;;  %v666_v38 = vld [vmem:[%s888_s7 + $0x38] sm:$0xff]   ;;  %v667_v39 = vld [vmem:[%s888_s7 + $0x30] sm:$0xff]  }
   0xa   :  { %v665_v26 = vld [vmem:[%s884_s5] sm:$0xff]   ;;  %v668_v40 = vld [vmem:[%s888_s7 + $0x28] sm:$0xff]   ;;  %v670_v42 = vld [vmem:[%s888_s7 + $0x18] sm:$0xff]  }
   0xb   :  { %565 = vmatpush3.bf16.msra.mxu0 %v644_v3  ;;  %585 = vmatpush3.bf16.msra.mxu1 %v656_v8  ;;  %v489_v27 = vld [vmem:[%s887_s3] ss:$0 sm:$0xff]  ;;  %v671_v43 = vld [vmem:[%s888_s7 + $0x10] sm:$0xff]   ;;  %v672_v44 = vld [vmem:[%s888_s7 + $0x8] sm:$0xff]  }
   0xc   :  { %566 = vmatprep.subr.bf16.mxu0 %v676_v0  ;;  %586 = vmatprep.subr.bf16.mxu1 %v676_v0  ;;  %v669_v41 = vld [vmem:[%s888_s7 + $0x20] sm:$0xff]  }
   0xd   :  { %v673_v45 = vld [vmem:[%s888_s7] sm:$0xff]  }
   0xe   :  { %v514_v47 = vld [vmem:[%s889_s6] ss:$0 sm:$0xff] }
   0xf   :  { %567 = vmatpush3.bf16.msra.mxu0 %v645_v4  ;;  %587 = vmatpush3.bf16.msra.mxu1 %v658_v10  ;;  %v515_v63 = vld [vmem:[%s890_s8] ss:$0 sm:$0xff] }
  0x10   :  { %568 = vmatprep.subr.bf16.mxu0 %v676_v0  ;;  %588 = vmatprep.subr.bf16.mxu1 %v676_v0 }
  0x13   :  { %569 = vmatpush3.bf16.msra.mxu0 %v646_v7  ;;  %589 = vmatpush3.bf16.msra.mxu1 %v660_v12 }
  0x14   :  { %570 = vmatprep.subr.bf16.mxu0 %v676_v0  ;;  %590 = vmatprep.subr.bf16.mxu1 %v676_v0 }
  0x17   :  { %571 = vmatpush3.bf16.msra.mxu0 %v647_v9  ;;  %591 = vmatpush3.bf16.msra.mxu1 %v662_v14 }
  0x18   :  { %572 = vmatprep.subr.bf16.mxu0 %v676_v0  ;;  %592 = vmatprep.subr.bf16.mxu1 %v676_v0 }
  0x1b   :  { %573 = vmatpush3.bf16.msra.mxu0 %v648_v11  ;;  %593 = vmatpush3.bf16.msra.mxu1 %v664_v17 }
  0x1c   :  { %574 = vmatprep.subr.bf16.mxu0 %v676_v0  ;;  %594 = vmatprep.subr.bf16.mxu1 %v676_v0 }
  0x1f   :  { %575 = vmatpush3.bf16.msra.mxu0 %v649_v13  ;;  %595 = vmatpush3.bf16.msra.mxu1 %v665_v26 }
  0x20   :  { %600 = vmatprep.subr.bf16.mxu0 %v676_v0  ;;  %620 = vmatprep.subr.bf16.mxu1 %v676_v0 }
  0x22   :  { %577 = vmatmul.mubr.bf16.vlgmr.msra.gmra.mxu0 %v33_v15 }
  0x23   :  { %601 = vmatpush3.bf16.msra.mxu0 %v650_v16  ;;  %616 = vmatprep.mubr.msk.bf16.mxu0 %vm677_vm0, %v676_v0 }
  0x24   :  { %602 = vmatprep.subr.bf16.mxu0 %v676_v0 }
  0x27   :  { %603 = vmatpush3.bf16.msra.mxu0 %v651_v18 }
  0x28   :  { %604 = vmatprep.subr.bf16.mxu0 %v676_v0 }
  0x2b   :  { %605 = vmatpush3.bf16.msra.mxu0 %v653_v19 }
  0x2c   :  { %606 = vmatprep.subr.bf16.mxu0 %v676_v0 }
  0x2f   :  { %607 = vmatpush3.bf16.msra.mxu0 %v655_v20 }
  0x30   :  { %608 = vmatprep.subr.bf16.mxu0 %v676_v0 }
  0x33   :  { %609 = vmatpush3.bf16.msra.mxu0 %v657_v21 }
  0x34   :  { %610 = vmatprep.subr.bf16.mxu0 %v676_v0 }
  0x37   :  { %611 = vmatpush3.bf16.msra.mxu0 %v659_v22 }
  0x38   :  { %612 = vmatprep.subr.bf16.mxu0 %v676_v0 }
  0x3b   :  { %613 = vmatpush3.bf16.msra.mxu0 %v661_v23 }
  0x3c   :  { %614 = vmatprep.subr.bf16.mxu0 %v676_v0 }
  0x3f   :  { %615 = vmatpush3.bf16.msra.mxu0 %v663_v24 }
  0x42   :  { %617 = vmatmul.mubr.bf16.vlgmr.msra.gmra.mxu0 %v145_v25 }
  0xe2   :  { %v139_v28 = vpop.f32.mrf.mxu0 }
  0xe3   :  { %v140_v29 = vadd.f32 %v489_v27, %v139_v28 }
  0xe4   :  { %v578_v30 = vpop.f32.mrf.mxu0 }
  0xe5   :  { %v162_v31 = vpack.c.bf16 %v140_v29, %v140_v29 }
  0xe6   :  { %v142_v32 = vpop.f32.mrf.mxu0 }
  0xe7   :  { %597 = vmatmul.mubr.bf16.vlgmr.msra.gmra.mxu1 %v162_v31 }
  0xe8   :  { %v579_v33 = vpop.f32.mrf.mxu0  ;;  %636 = vmatprep.mubr.msk.bf16.mxu1 %vm677_vm0, %v676_v0  ;;  %621 = vmatpush3.bf16.msra.mxu1 %v666_v38 }
  0xe9   :  { %622 = vmatprep.subr.bf16.mxu1 %v676_v0 }
  0xec   :  { %623 = vmatpush3.bf16.msra.mxu1 %v667_v39 }
  0xed   :  { %624 = vmatprep.subr.bf16.mxu1 %v676_v0 }
  0xf0   :  { %625 = vmatpush3.bf16.msra.mxu1 %v668_v40 }
  0xf1   :  { %626 = vmatprep.subr.bf16.mxu1 %v676_v0 }
  0xf4   :  { %627 = vmatpush3.bf16.msra.mxu1 %v669_v41 }
  0xf5   :  { %628 = vmatprep.subr.bf16.mxu1 %v676_v0 }
  0xf8   :  { %629 = vmatpush3.bf16.msra.mxu1 %v670_v42 }
  0xf9   :  { %630 = vmatprep.subr.bf16.mxu1 %v676_v0 }
  0xfc   :  { %631 = vmatpush3.bf16.msra.mxu1 %v671_v43 }
  0xfd   :  { %632 = vmatprep.subr.bf16.mxu1 %v676_v0 }
 0x100   :  { %633 = vmatpush3.bf16.msra.mxu1 %v672_v44 }
 0x101   :  { %634 = vmatprep.subr.bf16.mxu1 %v676_v0 }
 0x102   :  { %v349_v34 = vpop.f32.mrf.mxu0 }
 0x104   :  { %v618_v35 = vpop.f32.mrf.mxu0  ;;  %635 = vmatpush3.bf16.msra.mxu1 %v673_v45 }
 0x106   :  { %v352_v36 = vpop.f32.mrf.mxu0 }
 0x108   :  { %v619_v37 = vpop.f32.mrf.mxu0 }
 0x1a7   :  { %v261_v46 = vpop.f32.mrf.mxu1 }
 0x1a8   :  { %v350_v48 = vadd.f32 %v349_v34, %v261_v46 }
 0x1a9   :  { %v598_v49 = vpop.f32.mrf.mxu1 }
 0x1aa   :  { %v362_v50 = vadd.f32 %v514_v47, %v350_v48 }
 0x1ab   :  { %v264_v51 = vpop.f32.mrf.mxu1 }
 0x1ac   :  { %v363_v52 = vmul.f32 %v362_v50, %v362_v50 }
 0x1ad   :  { %v599_v53 = vpop.f32.mrf.mxu1 }
 0x1ae   :  { %v364_v54 = vmul.f32 %v363_v52, %v362_v50 }
 0x1b0   :  { %v365_v55 = vmul.f32 0.044715, %v364_v54 }
 0x1b2   :  { %v366_v56 = vadd.f32 %v365_v55, %v362_v50 }
 0x1b4   :  { %v367_v57 = vmul.f32 0.7978846, %v366_v56 }
 0x1b6   :  { %674 = vtanh.f32 %v367_v57 }
 0x1c3   :  { %v675_v58 = vpop.eup %674 }
 0x1c4   :  { %v369_v59 = vadd.f32 1.0, %v675_v58 }
 0x1c6   :  { %v370_v60 = vmul.f32 0.5, %v369_v59 }
 0x1c8   :  { %v371_v61 = vmul.f32 %v370_v60, %v362_v50 }
 0x1ca   :  { %v372_v62 = vpack.c.bf16 %v371_v61, %v371_v61 }
 0x1cc   :  { %637 = vmatmul.mubr.bf16.vlgmr.msra.gmra.mxu1 %v372_v62 }
 0x28c   :  { %v478_v0 = vpop.f32.mrf.mxu1 }
 0x28d   :  { %v479_v1 = vadd.f32 %v515_v63, %v478_v0 }
 0x28e   :  { %v638_v2 = vpop.f32.mrf.mxu1 }
 0x28f   :  { %484 = vst [vmem:[%s891_s9] sm:$0xff] %v479_v1 }
 0x290   :  { %v481_v3 = vpop.f32.mrf.mxu1 }
 0x292   :  { %v639_v4 = vpop.f32.mrf.mxu1 }

// kernel: jepa_forward.2
= control target key start
LH: loop header
LB: loop body
LE: loop exit
PB: predicated region body
PF: predicated region fallthrough
CT: control target
= control target key end

     0   :  { %v1257_v1 = vmov 0   ;;  %v64_v25 = vlaneseq  ;;  %v1258_v28 = vmov 0.0   ;;  %vm1259_vm0 = vmmov 0   ;;  %s1817_s1 = inlined_call_operand.vmem [shape: bf16[128,256], index: 1, kind: input, shape index: {}]   ;;  %s1818_s0 = inlined_call_operand.vmem [shape: bf16[128,128], index: 0, kind: input, shape index: {}]   ;;  %s1819_s3 = inlined_call_operand.vmem [shape: bf16[128,128], index: 3, kind: input, shape index: {}]   ;;  %s1820_s2 = inlined_call_operand.vmem [shape: f32[1,256], index: 2, kind: input, shape index: {}]   ;;  %s1821_s5 = inlined_call_operand.vmem [shape: bf16[128,128], index: 5, kind: input, shape index: {}]   ;;  %s1822_s4 = inlined_call_operand.vmem [shape: f32[1,128], index: 4, kind: input, shape index: {}]   ;;  %s1823_s7 = inlined_call_operand.vmem [shape: f32[8,128], index: 7, kind: output, shape index: {0}]   ;;  %s1824_s9 = inlined_call_operand.vmem [shape: bf16[8,128], index: 9, kind: output, shape index: {2}]   ;;  %s1825_s6 = inlined_call_operand.vmem [shape: f32[1,128], index: 6, kind: input, shape index: {}]   ;;  %s1826_s8 = inlined_call_operand.vmem [shape: f32[8,128], index: 8, kind: output, shape index: {1}]  }
   0x1   :  { %v1145_v0 = vld [vmem:[%s1817_s1 + $0x74] ss:$8 sps:$4 sm:$0xff]   ;;  %234 = vmatprep.mubr.bf16.mxu0 %v1257_v1  ;;  %v1147_v2 = vld [vmem:[%s1817_s1 + $0x70] ss:$8 sps:$4 sm:$0xff]   ;;  %v1148_v3 = vld [vmem:[%s1817_s1 + $0x64] ss:$8 sps:$4 sm:$0xff]   ;;  %1102 = vmatprep.subr.bf16.mxu1 %v1258_v28 }
   0x2   :  { %202 = vmatprep.subr.bf16.mxu0 %v1145_v0  ;;  %v1150_v4 = vld [vmem:[%s1817_s1 + $0x60] ss:$8 sps:$4 sm:$0xff]   ;;  %v1151_v5 = vld [vmem:[%s1817_s1 + $0x54] ss:$8 sps:$4 sm:$0xff]   ;;  %v1153_v6 = vld [vmem:[%s1817_s1 + $0x50] ss:$8 sps:$4 sm:$0xff]   ;;  %1118 = vmatprep.mubr.msk.bf16.mxu1 %vm1259_vm0, %v1258_v28 }
   0x3   :  { %203 = vmatpush1.bf16.msra.mxu0 %v1147_v2  ;;  %v1154_v7 = vld [vmem:[%s1817_s1 + $0x44] ss:$8 sps:$4 sm:$0xff]   ;;  %v1156_v8 = vld [vmem:[%s1817_s1 + $0x40] ss:$8 sps:$4 sm:$0xff]   ;;  %v1157_v9 = vld [vmem:[%s1817_s1 + $0x34] ss:$8 sps:$4 sm:$0xff]  }
   0x4   :  { %204 = vmatprep.subr.bf16.mxu0 %v1148_v3  ;;  %v1159_v10 = vld [vmem:[%s1817_s1 + $0x30] ss:$8 sps:$4 sm:$0xff]   ;;  %v1160_v11 = vld [vmem:[%s1817_s1 + $0x24] ss:$8 sps:$4 sm:$0xff]   ;;  %v1162_v12 = vld [vmem:[%s1817_s1 + $0x20] ss:$8 sps:$4 sm:$0xff]  }
   0x5   :  { %v1163_v13 = vld [vmem:[%s1817_s1 + $0x14] ss:$8 sps:$4 sm:$0xff]   ;;  %v1165_v14 = vld [vmem:[%s1817_s1 + $0x10] ss:$8 sps:$4 sm:$0xff]   ;;  %v1166_v15 = vld [vmem:[%s1817_s1 + $0x4] ss:$8 sps:$4 sm:$0xff]  }
   0x6   :  { %v1168_v16 = vld [vmem:[%s1817_s1] ss:$8 sps:$4 sm:$0xff]   ;;  %v1171_v19 = vld [vmem:[%s1818_s0 + $0x10] sm:$0xff]   ;;  %v1172_v20 = vld [vmem:[%s1818_s0 + $0x18] sm:$0xff]   ;;  %v65_v26 = vshrl.u32 %v64_v25, 7  ;;  %vm786_vm1 = vcmask 1041409  }
   0x7   :  { %205 = vmatpush1.bf16.msra.mxu0 %v1150_v4  ;;  %v1169_v17 = vld [vmem:[%s1818_s0] sm:$0xff]   ;;  %v1170_v18 = vld [vmem:[%s1818_s0 + $0x8] sm:$0xff]   ;;  %v1175_v23 = vld [vmem:[%s1818_s0 + $0x30] sm:$0xff]   ;;  %vm788_vm2 = vcmask 1042434   ;;  %vm790_vm3 = vcmask 1043459   ;;  %vm792_vm4 = vcmask 1044484  }
   0x8   :  { %206 = vmatprep.subr.bf16.mxu0 %v1151_v5  ;;  %v1173_v21 = vld [vmem:[%s1818_s0 + $0x20] sm:$0xff]   ;;  %v1174_v22 = vld [vmem:[%s1818_s0 + $0x28] sm:$0xff]   ;;  %v1176_v24 = vld [vmem:[%s1818_s0 + $0x38] sm:$0xff]   ;;  %v66_v30 = vsub.s32 0, %v65_v26  ;;  %v70_v32 = vsub.s32 1, %v65_v26  ;;  %vm794_vm5 = vcmask 1045509  }
   0x9   :  { %v1177_v27 = vld [vmem:[%s1819_s3 + $0x38] sm:$0xff]   ;;  %v1178_v29 = vld [vmem:[%s1819_s3 + $0x30] sm:$0xff]   ;;  %v62_v31 = vld [vmem:[%s1820_s2] sm:$0x3]  ;;  %vm796_vm6 = vcmask 1046534   ;;  %vm798_vm7 = vcmask 1047559  }
   0xa   :  { %1103 = vmatpush3.bf16.msra.mxu1 %v1177_v27  ;;  %v1179_v33 = vld [vmem:[%s1819_s3 + $0x28] sm:$0xff]   ;;  %v1397_v34 = vrot.slane %v62_v31, %v66_v30  ;;  %v1399_v35 = vrot.slane %v62_v31, %v70_v32  ;;  %v1180_v37 = vld [vmem:[%s1819_s3 + $0x20] sm:$0xff]   ;;  %v1181_v42 = vld [vmem:[%s1819_s3 + $0x18] sm:$0xff]  }
   0xb   :  { %207 = vmatpush1.bf16.msra.mxu0 %v1153_v6  ;;  %1104 = vmatprep.subr.bf16.mxu1 %v1258_v28  ;;  %v1182_v51 = vld [vmem:[%s1819_s3 + $0x10] sm:$0xff]   ;;  %v1183_v58 = vld [vmem:[%s1819_s3 + $0x8] sm:$0xff]  }
   0xc   :  { %208 = vmatprep.subr.bf16.mxu0 %v1154_v7  ;;  %v1184_v7 = vld [vmem:[%s1819_s3] sm:$0xff]  }
   0xe   :  { %1105 = vmatpush3.bf16.msra.mxu1 %v1178_v29 }
   0xf   :  { %209 = vmatpush1.bf16.msra.mxu0 %v1156_v8  ;;  %1106 = vmatprep.subr.bf16.mxu1 %v1258_v28 }
  0x10   :  { %210 = vmatprep.subr.bf16.mxu0 %v1157_v9 }
  0x12   :  { %1107 = vmatpush3.bf16.msra.mxu1 %v1179_v33 }
  0x13   :  { %211 = vmatpush1.bf16.msra.mxu0 %v1159_v10  ;;  %1108 = vmatprep.subr.bf16.mxu1 %v1258_v28 }
  0x14   :  { %212 = vmatprep.subr.bf16.mxu0 %v1160_v11 }
  0x16   :  { %1109 = vmatpush3.bf16.msra.mxu1 %v1180_v37 }
  0x17   :  { %213 = vmatpush1.bf16.msra.mxu0 %v1162_v12  ;;  %1110 = vmatprep.subr.bf16.mxu1 %v1258_v28 }
  0x18   :  { %214 = vmatprep.subr.bf16.mxu0 %v1163_v13 }
  0x1a   :  { %1111 = vmatpush3.bf16.msra.mxu1 %v1181_v42 }
  0x1b   :  { %215 = vmatpush1.bf16.msra.mxu0 %v1165_v14  ;;  %1112 = vmatprep.subr.bf16.mxu1 %v1258_v28 }
  0x1c   :  { %216 = vmatprep.subr.bf16.mxu0 %v1166_v15 }
  0x1e   :  { %1113 = vmatpush3.bf16.msra.mxu1 %v1182_v51 }
  0x1f   :  { %217 = vmatpush1.bf16.msra.mxu0 %v1168_v16  ;;  %1114 = vmatprep.subr.bf16.mxu1 %v1258_v28 }
  0x22   :  { %235 = vmatmul.mubr.bf16.vlgmr.msra.gmra.mxu0 %v1169_v17  ;;  %1115 = vmatpush3.bf16.msra.mxu1 %v1183_v58 }
  0x23   :  { %244 = vmatprep.mubr.bf16.mxu0 %v1257_v1  ;;  %1116 = vmatprep.subr.bf16.mxu1 %v1258_v28 }
  0x26   :  { %1117 = vmatpush3.bf16.msra.mxu1 %v1184_v7 }
  0x27   :  { %1122 = vmatprep.subr.bf16.mxu1 %v1258_v28 }
  0x2a   :  { %245 = vmatmul.mubr.bf16.gmra.mxu0 %v1170_v18 }
  0x2b   :  { %254 = vmatprep.mubr.bf16.mxu0 %v1257_v1 }
  0x32   :  { %255 = vmatmul.mubr.bf16.gmra.mxu0 %v1171_v19 }
  0x33   :  { %264 = vmatprep.mubr.bf16.mxu0 %v1257_v1 }
  0x3a   :  { %265 = vmatmul.mubr.bf16.gmra.mxu0 %v1172_v20 }
  0x3b   :  { %274 = vmatprep.mubr.bf16.mxu0 %v1257_v1 }
  0x42   :  { %275 = vmatmul.mubr.bf16.gmra.mxu0 %v1173_v21 }
  0x43   :  { %284 = vmatprep.mubr.bf16.mxu0 %v1257_v1 }
  0x4a   :  { %285 = vmatmul.mubr.bf16.gmra.mxu0 %v1174_v22 }
  0x4b   :  { %294 = vmatprep.mubr.bf16.mxu0 %v1257_v1 }
  0x52   :  { %295 = vmatmul.mubr.bf16.gmra.mxu0 %v1175_v23 }
  0x53   :  { %304 = vmatprep.mubr.bf16.mxu0 %v1257_v1 }
  0x5a   :  { %305 = vmatmul.mubr.bf16.gmra.mxu0 %v1176_v24 }
  0xe2   :  { %v236_v36 = vpop.f32.mrf.mxu0 }
  0xe3   :  { %v1406_v38 = vadd.f32 %v236_v36, %v1397_v34 }
  0xe4   :  { %v238_v39 = vpop.f32.mrf.mxu0 }
  0xe5   :  { %v1409_v40 = vadd.f32 %v238_v39, %v1399_v35  ;;  %v315_v45 = vmul.f32 %v1406_v38, %v1406_v38 }
  0xe6   :  { %v240_v41 = vpop.f32.mrf.mxu0 }
  0xe7   :  { %v316_v43 = vmul.f32 %v1409_v40, %v1409_v40  ;;  %v1418_v44 = vadd.f32 %v240_v41, %v1397_v34  ;;  %v347_v55 = vmul.f32 %v315_v45, %v1406_v38 }
  0xe8   :  { %v242_v46 = vpop.f32.mrf.mxu0 }
  0xe9   :  { %v348_v47 = vmul.f32 %v316_v43, %v1409_v40  ;;  %v317_v48 = vmul.f32 %v1418_v44, %v1418_v44  ;;  %v1426_v49 = vadd.f32 %v242_v46, %v1399_v35  ;;  %v379_v2 = vmul.f32 0.044715, %v347_v55 }
  0xea   :  { %v246_v50 = vpop.f32.mrf.mxu0 }
  0xeb   :  { %v380_v52 = vmul.f32 0.044715, %v348_v47  ;;  %v349_v53 = vmul.f32 %v317_v48, %v1418_v44  ;;  %v318_v54 = vmul.f32 %v1426_v49, %v1426_v49  ;;  %v1437_v56 = vadd.f32 %v246_v50, %v1397_v34 }
  0xec   :  { %v248_v57 = vpop.f32.mrf.mxu0  ;;  %v411_v16 = vadd.f32 %v379_v2, %v1406_v38 }
  0xed   :  { %v412_v59 = vadd.f32 %v380_v52, %v1409_v40  ;;  %v381_v60 = vmul.f32 0.044715, %v349_v53  ;;  %v350_v61 = vmul.f32 %v318_v54, %v1426_v49  ;;  %v1448_v62 = vadd.f32 %v248_v57, %v1399_v35 }
  0xee   :  { %v250_v63 = vpop.f32.mrf.mxu0  ;;  %v319_v3 = vmul.f32 %v1437_v56, %v1437_v56  ;;  %v443_v30 = vmul.f32 0.7978846, %v411_v16 }
  0xef   :  { %v444_v0 = vmul.f32 0.7978846, %v412_v59  ;;  %v382_v1 = vmul.f32 0.044715, %v350_v61  ;;  %v320_v4 = vmul.f32 %v1448_v62, %v1448_v62  ;;  %v1455_v5 = vadd.f32 %v250_v63, %v1397_v34 }
  0xf0   :  { %v252_v6 = vpop.f32.mrf.mxu0  ;;  %v413_v8 = vadd.f32 %v381_v60, %v1418_v44  ;;  %v351_v17 = vmul.f32 %v319_v3, %v1437_v56 }
  0xf1   :  { %1193 = vtanh.f32 %v444_v0  ;;  %v414_v9 = vadd.f32 %v382_v1, %v1426_v49  ;;  %v1463_v10 = vadd.f32 %v252_v6, %v1399_v35  ;;  %v352_v11 = vmul.f32 %v320_v4, %v1448_v62 }
  0xf2   :  { %v321_v12 = vmul.f32 %v1455_v5, %v1455_v5  ;;  %v256_v13 = vpop.f32.mrf.mxu0  ;;  %v445_v21 = vmul.f32 0.7978846, %v413_v8  ;;  %v383_v33 = vmul.f32 0.044715, %v351_v17 }
  0xf3   :  { %v446_v14 = vmul.f32 0.7978846, %v414_v9  ;;  %v322_v15 = vmul.f32 %v1463_v10, %v1463_v10  ;;  %v384_v18 = vmul.f32 0.044715, %v352_v11  ;;  %v1489_v45 = vadd.f32 %v256_v13, %v1397_v34 }
  0xf4   :  { %v353_v19 = vmul.f32 %v321_v12, %v1455_v5  ;;  %v258_v20 = vpop.f32.mrf.mxu0  ;;  %v415_v50 = vadd.f32 %v383_v33, %v1437_v56 }
  0xf5   :  { %1195 = vtanh.f32 %v446_v14  ;;  %v354_v22 = vmul.f32 %v322_v15, %v1463_v10  ;;  %v1476_v23 = vadd.f32 %v258_v20, %v1399_v35  ;;  %v416_v24 = vadd.f32 %v384_v18, %v1448_v62 }
  0xf6   :  { %v385_v25 = vmul.f32 0.044715, %v353_v19  ;;  %v260_v26 = vpop.f32.mrf.mxu0  ;;  %1197 = vtanh.f32 %v445_v21  ;;  %v323_v59 = vmul.f32 %v1489_v45, %v1489_v45  ;;  %v447_v0 = vmul.f32 0.7978846, %v415_v50 }
  0xf7   :  { %v386_v27 = vmul.f32 0.044715, %v354_v22  ;;  %v324_v29 = vmul.f32 %v1476_v23, %v1476_v23  ;;  %v448_v31 = vmul.f32 0.7978846, %v416_v24  ;;  %v1496_v52 = vadd.f32 %v260_v26, %v1397_v34 }
  0xf8   :  { %v262_v32 = vpop.f32.mrf.mxu0  ;;  %v417_v39 = vadd.f32 %v385_v25, %v1455_v5  ;;  %v355_v8 = vmul.f32 %v323_v59, %v1489_v45 }
  0xf9   :  { %v418_v36 = vadd.f32 %v386_v27, %v1463_v10  ;;  %v356_v37 = vmul.f32 %v324_v29, %v1476_v23  ;;  %1199 = vtanh.f32 %v448_v31  ;;  %v1486_v41 = vadd.f32 %v262_v32, %v1399_v35 }
  0xfa   :  { %v266_v42 = vpop.f32.mrf.mxu0  ;;  %1201 = vtanh.f32 %v443_v30  ;;  %v449_v54 = vmul.f32 0.7978846, %v417_v39  ;;  %v325_v1 = vmul.f32 %v1496_v52, %v1496_v52  ;;  %v387_v20 = vmul.f32 0.044715, %v355_v8 }
  0xfb   :  { %v450_v43 = vmul.f32 0.7978846, %v418_v36  ;;  %v388_v46 = vmul.f32 0.044715, %v356_v37  ;;  %v326_v47 = vmul.f32 %v1486_v41, %v1486_v41  ;;  %v1512_v14 = vadd.f32 %v266_v42, %v1397_v34 }
  0xfc   :  { %v268_v48 = vpop.f32.mrf.mxu0  ;;  %v357_v13 = vmul.f32 %v325_v1, %v1496_v52 }
  0xfd   :  { %1203 = vtanh.f32 %v450_v43  ;;  %v420_v51 = vadd.f32 %v388_v46, %v1476_v23  ;;  %v358_v55 = vmul.f32 %v326_v47, %v1486_v41  ;;  %v327_v27 = vmul.f32 %v1512_v14, %v1512_v14 }
  0xfe   :  { %v1194_v53 = vpop.eup %1193  ;;  %v270_v57 = vpop.f32.mrf.mxu0  ;;  %v389_v26 = vmul.f32 0.044715, %v357_v13 }
  0xff   :  { %v508_v58 = vadd.f32 1.0, %v1194_v53  ;;  %v452_v60 = vmul.f32 0.7978846, %v420_v51  ;;  %v390_v61 = vmul.f32 0.044715, %v358_v55  ;;  %v1508_v11 = vadd.f32 %v270_v57, %v1397_v34 }
 0x100   :  { %v1501_v63 = vpop.f32.mrf.mxu0  ;;  %v421_v39 = vadd.f32 %v389_v26, %v1496_v52  ;;  %v359_v42 = vmul.f32 %v327_v27, %v1512_v14 }
 0x101   :  { %1205 = vtanh.f32 %v452_v60  ;;  %v422_v3 = vadd.f32 %v390_v61, %v1486_v41  ;;  %v540_v6 = vmul.f32 0.5, %v508_v58  ;;  %v329_v22 = vmul.f32 %v1508_v11, %v1508_v11 }
 0x102   :  { %v1196_v2 = vpop.eup %1195  ;;  %v276_v4 = vpop.f32.mrf.mxu0  ;;  %1207 = vtanh.f32 %v449_v54  ;;  %v1533_v54 = vadd.f32 %v268_v48, %v1399_v35  ;;  %v453_v61 = vmul.f32 0.7978846, %v421_v39 }
 0x103   :  { %v510_v7 = vadd.f32 1.0, %v1196_v2  ;;  %v454_v9 = vmul.f32 0.7978846, %v422_v3  ;;  %1209 = vtanh.f32 %v447_v0  ;;  %v1198_v15 = vpop.eup %1197  ;;  %v572_v18 = vmul.f32 %v540_v6, %v1409_v40 }
 0x104   :  { %v1514_v16 = vpop.f32.mrf.mxu0  ;;  %v509_v30 = vadd.f32 1.0, %v1198_v15  ;;  %v419_v40 = vadd.f32 %v387_v20, %v1489_v45  ;;  %v361_v36 = vmul.f32 %v329_v22, %v1508_v11  ;;  %v391_v0 = vmul.f32 0.044715, %v359_v42 }
 0x105   :  { %v542_v12 = vmul.f32 0.5, %v510_v7  ;;  %1211 = vtanh.f32 %v454_v9  ;;  %v1537_v3 = vadd.f32 %v276_v4, %v1397_v34  ;;  %v328_v48 = vmul.f32 %v1533_v54, %v1533_v54 }
 0x106   :  { %v1200_v17 = vpop.eup %1199  ;;  %v1522_v31 = vpop.f32.mrf.mxu0  ;;  %v541_v46 = vmul.f32 0.5, %v509_v30  ;;  %v451_v53 = vmul.f32 0.7978846, %v419_v40  ;;  %v393_v59 = vmul.f32 0.044715, %v361_v36  ;;  %v1546_v4 = vadd.f32 %v1501_v63, %v1399_v35 }
 0x107   :  { %v574_v19 = vmul.f32 %v542_v12, %v1426_v49  ;;  %v512_v21 = vadd.f32 1.0, %v1200_v17  ;;  %v1202_v24 = vpop.eup %1201  ;;  %v1562_v39 = vadd.f32 %v1522_v31, %v1397_v34 }
 0x108   :  { %v507_v49 = vadd.f32 1.0, %v1202_v24  ;;  %v1528_v47 = vpop.f32.mrf.mxu0  ;;  %v573_v2 = vmul.f32 %v541_v46, %v1418_v44  ;;  %1213 = vtanh.f32 %v451_v53  ;;  %v425_v12 = vadd.f32 %v393_v59, %v1508_v11 }
 0x109   :  { %v610_v25 = vadd.f32 %v574_v19, %v572_v18  ;;  %v544_v32 = vmul.f32 0.5, %v512_v21  ;;  %1215 = vtanh.f32 %v453_v61  ;;  %v423_v44 = vadd.f32 %v391_v0, %v1512_v14 }
 0x10a   :  { %v1204_v29 = vpop.eup %1203  ;;  %v539_v57 = vmul.f32 0.5, %v507_v49  ;;  %v331_v19 = vmul.f32 %v1537_v3, %v1537_v3  ;;  %v457_v24 = vmul.f32 0.7978846, %v425_v12  ;;  %v330_v63 = vmul.f32 %v1546_v4, %v1546_v4 }
 0x10b   :  { %v514_v33 = vadd.f32 1.0, %v1204_v29  ;;  %v576_v50 = vmul.f32 %v544_v32, %v1448_v62  ;;  %v286_v62 = vpop.f32.mrf.mxu0  ;;  %v611_v17 = vrot.slane %v610_v25, 4  ;;  %v455_v27 = vmul.f32 0.7978846, %v423_v44 }
 0x10c   :  { %v571_v7 = vmul.f32 %v539_v57, %v1406_v38  ;;  %v360_v29 = vmul.f32 %v328_v48, %v1533_v54  ;;  %v363_v40 = vmul.f32 %v331_v19, %v1537_v3  ;;  %1217 = vtanh.f32 %v457_v24 }
 0x10d   :  { %v546_v37 = vmul.f32 0.5, %v514_v33  ;;  %v1550_v20 = vpop.f32.mrf.mxu0  ;;  %v612_v32 = vadd.f32 %v611_v17, %v610_v25  ;;  %1219 = vtanh.f32 %v455_v27  ;;  %v362_v25 = vmul.f32 %v330_v63, %v1546_v4 }
 0x10e   :  { %v1206_v43 = vpop.eup %1205  ;;  %v603_v15 = vadd.f32 %v573_v2, %v571_v7  ;;  %v395_v46 = vmul.f32 0.044715, %v363_v40 }
 0x10f   :  { %v578_v51 = vmul.f32 %v546_v37, %v1463_v10  ;;  %v1208_v55 = vpop.eup %1207  ;;  %v516_v58 = vadd.f32 1.0, %v1206_v43  ;;  %v290_v49 = vpop.f32.mrf.mxu0  ;;  %v613_v43 = vrot.slane %v612_v32, 2  ;;  %v394_v61 = vmul.f32 0.044715, %v362_v25 }
 0x110   :  { %v1210_v1 = vpop.eup %1209  ;;  %v513_v10 = vadd.f32 1.0, %v1208_v55  ;;  %v604_v30 = vrot.slane %v603_v15, 4  ;;  %v427_v0 = vadd.f32 %v395_v46, %v1537_v3 }
 0x111   :  { %v624_v60 = vadd.f32 %v578_v51, %v576_v50  ;;  %v548_v8 = vmul.f32 0.5, %v516_v58  ;;  %v511_v13 = vadd.f32 1.0, %v1210_v1  ;;  %v1565_v50 = vpop.f32.mrf.mxu0  ;;  %v614_v59 = vadd.f32 %v613_v43, %v612_v32 }
 0x112   :  { %v1212_v6 = vpop.eup %1211  ;;  %v545_v38 = vmul.f32 0.5, %v513_v10  ;;  %v605_v42 = vadd.f32 %v604_v30, %v603_v15  ;;  %v426_v44 = vadd.f32 %v394_v61, %v1546_v4  ;;  %v459_v15 = vmul.f32 0.7978846, %v427_v0 }
 0x113   :  { %v518_v9 = vadd.f32 1.0, %v1212_v6  ;;  %v580_v21 = vmul.f32 %v548_v8, %v1476_v23  ;;  %v543_v26 = vmul.f32 0.5, %v511_v13  ;;  %v625_v37 = vrot.slane %v624_v60, 4  ;;  %v296_v1 = vpop.f32.mrf.mxu0 }
 0x114   :  { %v577_v36 = vmul.f32 %v545_v38, %v1455_v5  ;;  %v333_v5 = vmul.f32 %v1562_v39, %v1562_v39  ;;  %v606_v31 = vrot.slane %v605_v42, 2  ;;  %v615_v13 = vrot.slane %v614_v59, 1 }
 0x115   :  { %v550_v18 = vmul.f32 0.5, %v518_v9  ;;  %v575_v23 = vmul.f32 %v543_v26, %v1437_v56  ;;  %v626_v53 = vadd.f32 %v625_v37, %v624_v60  ;;  %v1214_v55 = vpop.eup %1213  ;;  %v1574_v9 = vadd.f32 %v286_v62, %v1397_v34  ;;  %v298_v17 = vpop.f32.mrf.mxu0 }
 0x116   :  { %v365_v57 = vmul.f32 %v333_v5, %v1562_v39  ;;  %v1216_v58 = vpop.eup %1215  ;;  %v515_v10 = vadd.f32 1.0, %v1214_v55  ;;  %v1576_v12 = vadd.f32 %v606_v31, %v605_v42  ;;  %v1583_v62 = vadd.f32 %v1514_v16, %v1399_v35 }
 0x117   :  { %v582_v22 = vmul.f32 %v550_v18, %v1486_v41  ;;  %v392_v41 = vmul.f32 0.044715, %v360_v29  ;;  %v617_v51 = vadd.f32 %v577_v36, %v575_v23  ;;  %v627_v6 = vrot.slane %v626_v53, 2  ;;  %v300_v36 = vpop.f32.mrf.mxu0 }
 0x118   :  { %v397_v48 = vmul.f32 0.044715, %v365_v57  ;;  %v517_v60 = vadd.f32 1.0, %v1216_v58  ;;  %v547_v38 = vmul.f32 0.5, %v515_v10  ;;  %v608_v30 = vrot.slane %v1576_v12, 1 }
 0x119   :  { %v638_v33 = vadd.f32 %v582_v22, %v580_v21  ;;  %v424_v56 = vadd.f32 %v392_v41, %v1533_v54  ;;  %v618_v2 = vrot.slane %v617_v51, 4  ;;  %v628_v19 = vadd.f32 %v627_v6, %v626_v53  ;;  %v1218_v26 = vpop.eup %1217 }
 0x11a   :  { %v429_v8 = vadd.f32 %v397_v48, %v1562_v39  ;;  %v335_v21 = vmul.f32 %v1574_v9, %v1574_v9  ;;  %v549_v27 = vmul.f32 0.5, %v517_v60  ;;  %v1220_v63 = vpop.eup %1219  ;;  %v616_v32 = vadd.f32 %v615_v13, %v614_v59 }
 0x11b   :  { %v456_v7 = vmul.f32 0.7978846, %v424_v56  ;;  %v619_v18 = vadd.f32 %v618_v2, %v617_v51  ;;  %v639_v22 = vrot.slane %v638_v33, 4  ;;  %v458_v40 = vmul.f32 0.7978846, %v426_v44 }
 0x11c   :  { %v461_v24 = vmul.f32 0.7978846, %v429_v8  ;;  %v367_v29 = vmul.f32 %v335_v21, %v1574_v9  ;;  %v629_v23 = vrot.slane %v628_v19, 1  ;;  %v579_v41 = vmul.f32 %v547_v38, %v1489_v45 }
 0x11d   :  { %1221 = vtanh.f32 %v456_v7  ;;  %v620_v37 = vrot.slane %v619_v18, 2  ;;  %v640_v43 = vadd.f32 %v639_v22, %v638_v33  ;;  %v521_v25 = vadd.f32 1.0, %v1218_v26 }
 0x11e   :  { %1223 = vtanh.f32 %v459_v15  ;;  %v399_v42 = vmul.f32 0.044715, %v367_v29  ;;  %v1589_v16 = vadd.f32 %v290_v49, %v1397_v34  ;;  %v581_v46 = vmul.f32 %v549_v27, %v1496_v52  ;;  %v302_v49 = vpop.f32.mrf.mxu0 }
 0x11f   :  { %1225 = vtanh.f32 %v461_v24  ;;  %v519_v51 = vadd.f32 1.0, %v1220_v63  ;;  %v332_v53 = vmul.f32 %v1583_v62, %v1583_v62  ;;  %v1595_v55 = vmul.f32 0.0625, %v616_v32 }
 0x120   :  { %v431_v5 = vadd.f32 %v399_v42, %v1574_v9  ;;  %1227 = vtanh.f32 %v458_v40  ;;  %v1599_v45 = vadd.f32 %v1528_v47, %v1399_v35  ;;  %v337_v33 = vmul.f32 %v1589_v16, %v1589_v16  ;;  %v306_v60 = vpop.f32.mrf.mxu0 }
 0x121   :  { %v1603_v56 = vadd.f32 %v620_v37, %v619_v18  ;;  %v1607_v57 = vadd.f32 %v1550_v20, %v1399_v35  ;;  %v1611_v58 = vadd.f32 %v1565_v50, %v1399_v35  ;;  %v630_v31 = vadd.f32 %v629_v23, %v628_v19 }
 0x122   :  { %v463_v52 = vmul.f32 0.7978846, %v431_v5  ;;  %v641_v59 = vrot.slane %v640_v43, 2  ;;  %v553_v61 = vmul.f32 0.5, %v521_v25  ;;  %v369_v47 = vmul.f32 %v337_v33, %v1589_v16  ;;  %v308_v32 = vpop.f32.mrf.mxu0 }
 0x123   :  { %v1614_v0 = vadd.f32 %v581_v46, %v579_v41  ;;  %v551_v2 = vmul.f32 0.5, %v519_v51  ;;  %v364_v6 = vmul.f32 %v332_v53, %v1583_v62  ;;  %v1618_v10 = vadd.f32 %v296_v1, %v1397_v34 }
 0x124   :  { %v732_v20 = vpack.c.bf16 %v1595_v55, %v1595_v55  ;;  %v334_v50 = vmul.f32 %v1599_v45, %v1599_v45  ;;  %1229 = vtanh.f32 %v463_v52  ;;  %v401_v48 = vmul.f32 0.044715, %v369_v47 }
 0x125   :  { %v336_v7 = vmul.f32 %v1607_v57, %v1607_v57  ;;  %v338_v8 = vmul.f32 %v1611_v58, %v1611_v58  ;;  %v339_v13 = vmul.f32 %v1618_v10, %v1618_v10  ;;  %v1631_v1 = vadd.f32 %v300_v36, %v1397_v34 }
 0x126   :  { %v1633_v44 = vmul.f32 0.0625, %v630_v31  ;;  %v642_v15 = vadd.f32 %v641_v59, %v640_v43  ;;  %v585_v18 = vmul.f32 %v553_v61, %v1508_v11  ;;  %v433_v19 = vadd.f32 %v401_v48, %v1589_v16  ;;  %v310_v31 = vpop.f32.mrf.mxu0 }
 0x127   :  { %v396_v38 = vmul.f32 0.044715, %v364_v6  ;;  %v371_v21 = vmul.f32 %v339_v13, %v1618_v10  ;;  %v1639_v22 = vadd.f32 %v298_v17, %v1399_v35  ;;  %v341_v24 = vmul.f32 %v1631_v1, %v1631_v1 }
 0x128   :  { %v632_v27 = vrot.slane %v1614_v0, 4  ;;  %v366_v29 = vmul.f32 %v334_v50, %v1599_v45  ;;  %v465_v63 = vmul.f32 0.7978846, %v433_v19  ;;  %v1648_v11 = vadd.f32 %v302_v49, %v1399_v35 }
 0x129   :  { %v583_v36 = vmul.f32 %v551_v2, %v1512_v14  ;;  %v368_v17 = vmul.f32 %v336_v7, %v1607_v57  ;;  %v370_v37 = vmul.f32 %v338_v8, %v1611_v58  ;;  %v403_v23 = vmul.f32 0.044715, %v371_v21 }
 0x12a   :  { %v1643_v26 = vpop.eup %1221  ;;  %v734_v41 = vpack.c.bf16 %v1633_v44, %v1633_v44  ;;  %v643_v42 = vrot.slane %v642_v15, 1  ;;  %1231 = vtanh.f32 %v465_v63  ;;  %v373_v43 = vmul.f32 %v341_v24, %v1631_v1 }
 0x12b   :  { %v1224_v40 = vpop.eup %1223  ;;  %v1656_v46 = vadd.f32 %v585_v18, %v583_v36  ;;  %v428_v51 = vadd.f32 %v396_v38, %v1583_v62  ;;  %v435_v53 = vadd.f32 %v403_v23, %v1618_v10  ;;  %v340_v14 = vmul.f32 %v1639_v22, %v1639_v22 }
 0x12c   :  { %v1226_v25 = vpop.eup %1225  ;;  %v523_v5 = vadd.f32 1.0, %v1224_v40  ;;  %v398_v33 = vmul.f32 0.044715, %v366_v29  ;;  %v405_v49 = vmul.f32 0.044715, %v373_v43  ;;  %v342_v52 = vmul.f32 %v1648_v11, %v1648_v11 }
 0x12d   :  { %v1664_v59 = vpop.eup %1227  ;;  %v400_v61 = vmul.f32 0.044715, %v368_v17  ;;  %v402_v47 = vmul.f32 0.044715, %v370_v37  ;;  %v467_v2 = vmul.f32 0.7978846, %v435_v53  ;;  %v1667_v6 = vadd.f32 %v306_v60, %v1397_v34  ;;  %v312_v17 = vpop.f32.mrf.mxu0 }
 0x12e   :  { %v525_v50 = vadd.f32 1.0, %v1226_v25  ;;  %v437_v48 = vadd.f32 %v405_v49, %v1631_v1  ;;  %v374_v7 = vmul.f32 %v342_v52, %v1648_v11  ;;  %v1672_v8 = vadd.f32 %v308_v32, %v1399_v35 }
 0x12f   :  { %1233 = vtanh.f32 %v467_v2  ;;  %v372_v13 = vmul.f32 %v340_v14, %v1639_v22  ;;  %v343_v18 = vmul.f32 %v1667_v6, %v1667_v6  ;;  %v1678_v19 = vadd.f32 %v310_v31, %v1397_v34 }
 0x130   :  { %v644_v38 = vadd.f32 %v643_v42, %v642_v15  ;;  %v460_v60 = vmul.f32 0.7978846, %v428_v51  ;;  %v430_v21 = vadd.f32 %v398_v33, %v1599_v45  ;;  %v469_v24 = vmul.f32 0.7978846, %v437_v48 }
 0x131   :  { %v1230_v29 = vpop.eup %1229  ;;  %v555_v63 = vmul.f32 0.5, %v523_v5  ;;  %v432_v40 = vadd.f32 %v400_v61, %v1607_v57  ;;  %v375_v32 = vmul.f32 %v343_v18, %v1667_v6  ;;  %v344_v36 = vmul.f32 %v1672_v8, %v1672_v8 }
 0x132   :  { %v557_v37 = vmul.f32 0.5, %v525_v50  ;;  %1235 = vtanh.f32 %v469_v24  ;;  %v406_v23 = vmul.f32 0.044715, %v374_v7  ;;  %v345_v34 = vmul.f32 %v1678_v19, %v1678_v19 }
 0x133   :  { %v434_v15 = vadd.f32 %v402_v47, %v1611_v58  ;;  %v404_v42 = vmul.f32 0.044715, %v372_v13  ;;  %v407_v43 = vmul.f32 0.044715, %v375_v32  ;;  %v376_v25 = vmul.f32 %v344_v36, %v1672_v8 }
 0x134   :  { %1237 = vtanh.f32 %v460_v60  ;;  %v527_v51 = vadd.f32 1.0, %v1230_v29  ;;  %v377_v53 = vmul.f32 %v345_v34, %v1678_v19  ;;  %v1691_v14 = vadd.f32 %v312_v17, %v1399_v35 }
 0x135   :  { %v587_v5 = vmul.f32 %v555_v63, %v1537_v3  ;;  %v462_v33 = vmul.f32 0.7978846, %v430_v21  ;;  %v439_v49 = vadd.f32 %v407_v43, %v1667_v6  ;;  %v408_v52 = vmul.f32 0.044715, %v376_v25 }
 0x136   :  { %v589_v31 = vmul.f32 %v557_v37, %v1562_v39  ;;  %v464_v61 = vmul.f32 0.7978846, %v432_v40  ;;  %v438_v47 = vadd.f32 %v406_v23, %v1648_v11  ;;  %v409_v2 = vmul.f32 0.044715, %v377_v53 }
 0x137   :  { %v1232_v50 = vpop.eup %1231  ;;  %v466_v48 = vmul.f32 0.7978846, %v434_v15  ;;  %v436_v7 = vadd.f32 %v404_v42, %v1639_v22  ;;  %v471_v13 = vmul.f32 0.7978846, %v439_v49  ;;  %v346_v35 = vmul.f32 %v1691_v14, %v1691_v14 }
 0x138   :  { %v559_v18 = vmul.f32 0.5, %v527_v51  ;;  %v529_v3 = vadd.f32 1.0, %v1232_v50  ;;  %v440_v60 = vadd.f32 %v408_v52, %v1672_v8  ;;  %v441_v21 = vadd.f32 %v409_v2, %v1678_v19 }
 0x139   :  { %v720_v24 = vmul.f32 0.0625, %v644_v38  ;;  %v646_v39 = vrot.slane %v1656_v46, 4  ;;  %1239 = vtanh.f32 %v471_v13  ;;  %v378_v29 = vmul.f32 %v346_v35, %v1691_v14 }
 0x13a   :  { %v659_v63 = vadd.f32 %v589_v31, %v587_v5  ;;  %1241 = vtanh.f32 %v462_v33  ;;  %v561_v40 = vmul.f32 0.5, %v529_v3  ;;  %v470_v32 = vmul.f32 0.7978846, %v438_v47 }
 0x13b   :  { %1243 = vtanh.f32 %v464_v61  ;;  %v468_v36 = vmul.f32 0.7978846, %v436_v7  ;;  %v473_v17 = vmul.f32 0.7978846, %v441_v21  ;;  %v410_v37 = vmul.f32 0.044715, %v378_v29 }
 0x13c   :  { %v1234_v23 = vpop.eup %1233  ;;  %v591_v34 = vmul.f32 %v559_v18, %v1574_v9  ;;  %v593_v15 = vmul.f32 %v561_v40, %v1589_v16  ;;  %1245 = vtanh.f32 %v466_v48  ;;  %v472_v38 = vmul.f32 0.7978846, %v440_v60 }
 0x13d   :  { %v736_v42 = vpack.c.bf16 %v720_v24, %v720_v24  ;;  %v531_v43 = vadd.f32 1.0, %v1234_v23  ;;  %1247 = vtanh.f32 %v473_v17  ;;  %v442_v25 = vadd.f32 %v410_v37, %v1691_v14 }
 0x13e   :  { %v622_v51 = vrot.slane %v1603_v56, 1  ;;  %v660_v53 = vrot.slane %v659_v63, 4  ;;  %v673_v5 = vadd.f32 %v593_v15, %v591_v34  ;;  %1249 = vtanh.f32 %v470_v32 }
 0x13f   :  { %v1236_v33 = vpop.eup %1235  ;;  %v922_v49 = vunpack.c.l.b16 %v734_v41  ;;  %v633_v9 = vadd.f32 %v632_v27, %v1614_v0  ;;  %1251 = vtanh.f32 %v468_v36  ;;  %v474_v16 = vmul.f32 0.7978846, %v442_v25 }
 0x140   :  { %v674_v52 = vrot.slane %v673_v5, 4  ;;  %v563_v31 = vmul.f32 0.5, %v531_v43  ;;  %v533_v61 = vadd.f32 1.0, %v1236_v33  ;;  %1253 = vtanh.f32 %v472_v38 }
 0x141   :  { %v1238_v47 = vpop.eup %1237  ;;  %v921_v2 = vunpack.c.l.b16 %v732_v20  ;;  %v923_v50 = vunpack.c.l.b16 %v736_v42  ;;  %v647_v48 = vadd.f32 %v646_v39, %v1656_v46  ;;  %1255 = vtanh.f32 %v474_v16 }
 0x142   :  { %v609_v44 = vadd.f32 %v608_v30, %v1576_v12  ;;  %v520_v0 = vadd.f32 1.0, %v1643_v26  ;;  %v661_v27 = vadd.f32 %v660_v53, %v659_v63  ;;  %v565_v41 = vmul.f32 0.5, %v533_v61 }
 0x143   :  { %v623_v7 = vadd.f32 %v622_v51, %v1603_v56  ;;  %v675_v13 = vadd.f32 %v674_v52, %v673_v5  ;;  %v929_v35 = vsel %vm786_vm1, %v922_v49, %v921_v2  ;;  %v634_v18 = vrot.slane %v633_v9, 2 }
 0x144   :  { %v595_v55 = vmul.f32 %v563_v31, %v1618_v10  ;;  %v597_v20 = vmul.f32 %v565_v41, %v1631_v1  ;;  %v648_v46 = vrot.slane %v647_v48, 2  ;;  %v1727_v3 = vsel %vm788_vm2, %v923_v50, %v929_v35 }
 0x145   :  { %v1729_v30 = vmul.f32 0.0625, %v609_v44  ;;  %v552_v26 = vmul.f32 0.5, %v520_v0  ;;  %v662_v60 = vrot.slane %v661_v27, 2  ;;  %v1731_v24 = vmul.f32 0.0625, %v623_v7 }
 0x146   :  { %v1240_v12 = vpop.eup %1239  ;;  %v687_v21 = vadd.f32 %v597_v20, %v595_v55  ;;  %v676_v39 = vrot.slane %v675_v13, 2  ;;  %v635_v10 = vadd.f32 %v634_v18, %v633_v9  ;;  %v522_v1 = vadd.f32 1.0, %v1664_v59 }
 0x147   :  { %v1242_v56 = vpop.eup %1241  ;;  %v535_v29 = vadd.f32 1.0, %v1240_v12  ;;  %v649_v36 = vadd.f32 %v648_v46, %v647_v48  ;;  %v731_v37 = vpack.c.bf16 %v1729_v30, %v1729_v30  ;;  %v584_v23 = vmul.f32 %v552_v26, %v1533_v54 }
 0x148   :  { %v1244_v63 = vpop.eup %1243  ;;  %v688_v40 = vrot.slane %v687_v21, 4  ;;  %v663_v34 = vadd.f32 %v662_v60, %v661_v27  ;;  %v733_v42 = vpack.c.bf16 %v1731_v24, %v1731_v24  ;;  %v677_v43 = vadd.f32 %v676_v39, %v675_v13 }
 0x149   :  { %v1246_v32 = vpop.eup %1245  ;;  %v567_v25 = vmul.f32 0.5, %v535_v29  ;;  %v636_v59 = vrot.slane %v635_v10, 1  ;;  %v554_v5 = vmul.f32 0.5, %v522_v1  ;;  %v526_v33 = vadd.f32 1.0, %v1242_v56 }
 0x14a   :  { %v1248_v17 = vpop.eup %1247  ;;  %v689_v15 = vadd.f32 %v688_v40, %v687_v21  ;;  %v650_v16 = vrot.slane %v649_v36, 1  ;;  %v524_v52 = vadd.f32 1.0, %v1238_v47  ;;  %v530_v31 = vadd.f32 1.0, %v1246_v32 }
 0x14b   :  { %v1250_v38 = vpop.eup %1249  ;;  %v537_v51 = vadd.f32 1.0, %v1248_v17  ;;  %v664_v2 = vrot.slane %v663_v34, 1  ;;  %v528_v50 = vadd.f32 1.0, %v1244_v63  ;;  %v678_v0 = vrot.slane %v677_v43, 1 }
 0x14c   :  { %v1252_v53 = vpop.eup %1251  ;;  %v690_v49 = vrot.slane %v689_v15, 2  ;;  %v534_v48 = vadd.f32 1.0, %v1250_v38  ;;  %v599_v27 = vmul.f32 %v567_v25, %v1667_v6  ;;  %v637_v13 = vadd.f32 %v636_v59, %v635_v10 }
 0x14d   :  { %v1254_v9 = vpop.eup %1253  ;;  %v569_v61 = vmul.f32 0.5, %v537_v51  ;;  %v558_v35 = vmul.f32 0.5, %v526_v33  ;;  %v532_v18 = vadd.f32 1.0, %v1252_v53  ;;  %v651_v20 = vadd.f32 %v650_v16, %v649_v36 }
 0x14e   :  { %v1256_v54 = vpop.eup %1255  ;;  %v691_v44 = vadd.f32 %v690_v49, %v689_v15  ;;  %v562_v46 = vmul.f32 0.5, %v530_v31  ;;  %v536_v47 = vadd.f32 1.0, %v1254_v9  ;;  %v586_v26 = vmul.f32 %v554_v5, %v1546_v4 }
 0x14f   :  { %v601_v41 = vmul.f32 %v569_v61, %v1678_v19  ;;  %v538_v7 = vadd.f32 1.0, %v1256_v54  ;;  %v556_v60 = vmul.f32 0.5, %v524_v52  ;;  %v665_v21 = vadd.f32 %v664_v2, %v663_v34 }
 0x150   :  { %v692_v55 = vrot.slane %v691_v44, 1  ;;  %v566_v56 = vmul.f32 0.5, %v534_v48  ;;  %v560_v39 = vmul.f32 0.5, %v528_v50  ;;  %v679_v6 = vadd.f32 %v678_v0, %v677_v43 }
 0x151   :  { %v701_v12 = vadd.f32 %v601_v41, %v599_v27  ;;  %v570_v63 = vmul.f32 0.5, %v538_v7  ;;  %v719_v1 = vmul.f32 0.0625, %v637_v13  ;;  %v590_v19 = vmul.f32 %v558_v35, %v1599_v45 }
 0x152   :  { %v564_v10 = vmul.f32 0.5, %v532_v18  ;;  %v693_v40 = vadd.f32 %v692_v55, %v691_v44  ;;  %v721_v32 = vmul.f32 0.0625, %v651_v20  ;;  %v594_v36 = vmul.f32 %v562_v46, %v1611_v58 }
 0x153   :  { %v702_v29 = vrot.slane %v701_v12, 4  ;;  %v568_v17 = vmul.f32 0.5, %v536_v47  ;;  %v652_v38 = vadd.f32 %v586_v26, %v584_v23  ;;  %v588_v4 = vmul.f32 %v556_v60, %v1583_v62 }
 0x154   :  { %v598_v34 = vmul.f32 %v566_v56, %v1648_v11  ;;  %v723_v25 = vmul.f32 0.0625, %v665_v21  ;;  %v592_v51 = vmul.f32 %v560_v39, %v1607_v57  ;;  %v602_v43 = vmul.f32 %v570_v63, %v1691_v14 }
 0x155   :  { %v703_v15 = vadd.f32 %v702_v29, %v701_v12  ;;  %v725_v59 = vmul.f32 0.0625, %v679_v6  ;;  %v735_v45 = vpack.c.bf16 %v719_v1, %v719_v1  ;;  %v666_v5 = vadd.f32 %v590_v19, %v588_v4  ;;  %v1185_v6 = vld [vmem:[%s1821_s5 + $0x38] sm:$0xff]  }
 0x156   :  { %v596_v33 = vmul.f32 %v564_v10, %v1639_v22  ;;  %v727_v49 = vmul.f32 0.0625, %v693_v40  ;;  %v737_v58 = vpack.c.bf16 %v721_v32, %v721_v32  ;;  %v680_v9 = vadd.f32 %v594_v36, %v592_v51  ;;  %v1187_v51 = vld [vmem:[%s1821_s5 + $0x28] sm:$0xff]  }
 0x157   :  { %v704_v53 = vrot.slane %v703_v15, 2  ;;  %v600_v23 = vmul.f32 %v568_v17, %v1672_v8  ;;  %v653_v62 = vrot.slane %v652_v38, 4  ;;  %v739_v11 = vpack.c.bf16 %v723_v25, %v723_v25  ;;  %v1186_v17 = vld [vmem:[%s1821_s5 + $0x30] sm:$0xff]  }
 0x158   :  { %v694_v52 = vadd.f32 %v598_v34, %v596_v33  ;;  %v779_v57 = vunpack.c.l.b16 %v733_v42  ;;  %v741_v61 = vpack.c.bf16 %v725_v59, %v725_v59  ;;  %v780_v54 = vunpack.c.l.b16 %v735_v45  ;;  %v1188_v33 = vld [vmem:[%s1821_s5 + $0x20] sm:$0xff]  }
 0x159   :  { %v705_v16 = vadd.f32 %v704_v53, %v703_v15  ;;  %v708_v14 = vadd.f32 %v602_v43, %v600_v23  ;;  %v667_v2 = vrot.slane %v666_v5, 4  ;;  %v743_v50 = vpack.c.bf16 %v727_v49, %v727_v49 }
 0x15a   :  { %v778_v22 = vunpack.c.l.b16 %v731_v37  ;;  %v681_v8 = vrot.slane %v680_v9, 4  ;;  %v781_v44 = vunpack.c.l.b16 %v737_v58  ;;  %v654_v0 = vadd.f32 %v653_v62, %v652_v38  ;;  %v1189_v62 = vld [vmem:[%s1821_s5 + $0x18] sm:$0xff]  }
 0x15b   :  { %v706_v31 = vrot.slane %v705_v16, 1  ;;  %v695_v27 = vrot.slane %v694_v52, 4  ;;  %v782_v41 = vunpack.c.l.b16 %v739_v11  ;;  %v709_v24 = vrot.slane %v708_v14, 4 }
 0x15c   :  { %v783_v7 = vunpack.c.l.b16 %v741_v61  ;;  %v787_v13 = vsel %vm786_vm1, %v779_v57, %v778_v22  ;;  %v668_v35 = vadd.f32 %v667_v2, %v666_v5  ;;  %v784_v18 = vunpack.c.l.b16 %v743_v50 }
 0x15d   :  { %v707_v48 = vadd.f32 %v706_v31, %v705_v16  ;;  %v789_v55 = vsel %vm788_vm2, %v780_v54, %v787_v13  ;;  %v682_v20 = vadd.f32 %v681_v8, %v680_v9  ;;  %v696_v46 = vadd.f32 %v695_v27, %v694_v52  ;;  %v1190_v31 = vld [vmem:[%s1821_s5 + $0x10] sm:$0xff]   ;;  %v1191_v8 = vld [vmem:[%s1821_s5 + $0x8] sm:$0xff]  }
 0x15e   :  { %v791_v37 = vsel %vm790_vm3, %v781_v44, %v789_v55  ;;  %v655_v12 = vrot.slane %v654_v0, 2  ;;  %v710_v26 = vadd.f32 %v709_v24, %v708_v14  ;;  %v669_v56 = vrot.slane %v668_v35, 2  ;;  %v1192_v24 = vld [vmem:[%s1821_s5] sm:$0xff]  }
 0x15f   :  { %v729_v42 = vmul.f32 0.0625, %v707_v48  ;;  %v793_v47 = vsel %vm792_vm4, %v782_v41, %v791_v37  ;;  %v683_v29 = vrot.slane %v682_v20, 2  ;;  %v697_v1 = vrot.slane %v696_v46, 2 }
 0x160   :  { %v795_v21 = vsel %vm794_vm5, %v783_v7, %v793_v47  ;;  %v656_v10 = vadd.f32 %v655_v12, %v654_v0  ;;  %v711_v40 = vrot.slane %v710_v26, 2  ;;  %v670_v32 = vadd.f32 %v669_v56, %v668_v35 }
 0x161   :  { %v745_v30 = vpack.c.bf16 %v729_v42, %v729_v42  ;;  %v797_v39 = vsel %vm796_vm6, %v784_v18, %v795_v21  ;;  %v684_v36 = vadd.f32 %v683_v29, %v682_v20  ;;  %v698_v15 = vadd.f32 %v697_v1, %v696_v46  ;;  %v1075_v46 = vld [vmem:[%s1825_s6] ss:$0 sm:$0xff] }
 0x162   :  { %v657_v38 = vrot.slane %v656_v10, 1  ;;  %v712_v4 = vadd.f32 %v711_v40, %v710_v26  ;;  %v671_v34 = vrot.slane %v670_v32, 1 }
 0x163   :  { %v785_v60 = vunpack.c.l.b16 %v745_v30  ;;  %v685_v25 = vrot.slane %v684_v36, 1  ;;  %v699_v43 = vrot.slane %v698_v15, 1 }
 0x164   :  { %v658_v53 = vadd.f32 %v657_v38, %v656_v10  ;;  %v713_v59 = vrot.slane %v712_v4, 1  ;;  %v672_v45 = vadd.f32 %v671_v34, %v670_v32 }
 0x165   :  { %v799_v63 = vsel %vm798_vm7, %v785_v60, %v797_v39  ;;  %v686_v5 = vadd.f32 %v685_v25, %v684_v36  ;;  %v700_v49 = vadd.f32 %v699_v43, %v698_v15 }
 0x166   :  { %v800_v19 = vpack.c.b16 %v799_v63, %v799_v63  ;;  %v722_v58 = vmul.f32 0.0625, %v658_v53  ;;  %v714_v9 = vadd.f32 %v713_v59, %v712_v4  ;;  %v724_v23 = vmul.f32 0.0625, %v672_v45 }
 0x167   :  { %v726_v16 = vmul.f32 0.0625, %v686_v5  ;;  %v728_v52 = vmul.f32 0.0625, %v700_v49 }
 0x168   :  { %1119 = vmatmul.mubr.bf16.vlgmr.msra.gmra.mxu1 %v800_v19  ;;  %v738_v11 = vpack.c.bf16 %v722_v58, %v722_v58  ;;  %v730_v57 = vmul.f32 0.0625, %v714_v9  ;;  %v740_v14 = vpack.c.bf16 %v724_v23, %v724_v23 }
 0x169   :  { %1123 = vmatpush3.bf16.msra.mxu1 %v1185_v6  ;;  %1138 = vmatprep.mubr.msk.bf16.mxu1 %vm1259_vm0, %v1258_v28  ;;  %v742_v61 = vpack.c.bf16 %v726_v16, %v726_v16  ;;  %v744_v54 = vpack.c.bf16 %v728_v52, %v728_v52 }
 0x16a   :  { %1124 = vmatprep.subr.bf16.mxu1 %v1258_v28  ;;  %v924_v2 = vunpack.c.l.b16 %v738_v11  ;;  %v746_v50 = vpack.c.bf16 %v730_v57, %v730_v57  ;;  %v925_v22 = vunpack.c.l.b16 %v740_v14 }
 0x16b   :  { %v926_v48 = vunpack.c.l.b16 %v742_v61  ;;  %v927_v44 = vunpack.c.l.b16 %v744_v54 }
 0x16c   :  { %v928_v0 = vunpack.c.l.b16 %v746_v50  ;;  %v931_v27 = vsel %vm790_vm3, %v924_v2, %v1727_v3  ;;  %v1066_v3 = vld [vmem:[%s1822_s4] ss:$0 sm:$0xff] }
 0x16d   :  { %1125 = vmatpush3.bf16.msra.mxu1 %v1186_v17  ;;  %v932_v41 = vsel %vm792_vm4, %v925_v22, %v931_v27 }
 0x16e   :  { %1126 = vmatprep.subr.bf16.mxu1 %v1258_v28  ;;  %v933_v42 = vsel %vm794_vm5, %v926_v48, %v932_v41 }
 0x16f   :  { %v934_v7 = vsel %vm796_vm6, %v927_v44, %v933_v42 }
 0x170   :  { %v935_v13 = vsel %vm798_vm7, %v928_v0, %v934_v7 }
 0x171   :  { %1127 = vmatpush3.bf16.msra.mxu1 %v1187_v51  ;;  %v936_v35 = vpack.c.b16 %v935_v13, %v935_v13 }
 0x172   :  { %1128 = vmatprep.subr.bf16.mxu1 %v1258_v28 }
 0x175   :  { %1129 = vmatpush3.bf16.msra.mxu1 %v1188_v33 }
 0x176   :  { %1130 = vmatprep.subr.bf16.mxu1 %v1258_v28 }
 0x179   :  { %1131 = vmatpush3.bf16.msra.mxu1 %v1189_v62 }
 0x17a   :  { %1132 = vmatprep.subr.bf16.mxu1 %v1258_v28 }
 0x17d   :  { %1133 = vmatpush3.bf16.msra.mxu1 %v1190_v31 }
 0x17e   :  { %1134 = vmatprep.subr.bf16.mxu1 %v1258_v28 }
 0x181   :  { %1135 = vmatpush3.bf16.msra.mxu1 %v1191_v8 }
 0x182   :  { %1136 = vmatprep.subr.bf16.mxu1 %v1258_v28 }
 0x185   :  { %1137 = vmatpush3.bf16.msra.mxu1 %v1192_v24 }
 0x188   :  { %1139 = vmatmul.mubr.bf16.vlgmr.msra.gmra.mxu1 %v936_v35 }
 0x228   :  { %v884_v18 = vpop.f32.mrf.mxu1 }
 0x229   :  { %v885_v55 = vadd.f32 %v1066_v3, %v884_v18 }
 0x22a   :  { %v1120_v20 = vpop.f32.mrf.mxu1 }
 0x22b   :  { %1026 = vst [vmem:[%s1823_s7] sm:$0xff] %v885_v55  ;;  %v1028_v30 = vpack.c.bf16 %v885_v55, %v885_v55 }
 0x22c   :  { %v887_v28 = vpop.f32.mrf.mxu1 }
 0x22d   :  { %1029 = vst [vmem:[%s1824_s9] sm:$0xf] %v1028_v30 }
 0x22e   :  { %v1121_v37 = vpop.f32.mrf.mxu1 }
 0x248   :  { %v1020_v47 = vpop.f32.mrf.mxu1 }
 0x249   :  { %v1021_v12 = vadd.f32 %v1075_v46, %v1020_v47 }
 0x24a   :  { %v1140_v26 = vpop.f32.mrf.mxu1 }
 0x24b   :  { %1027 = vst [vmem:[%s1826_s8] sm:$0xff] %v1021_v12 }
 0x24c   :  { %v1023_v60 = vpop.f32.mrf.mxu1 }
 0x24e   :  { %v1141_v21 = vpop.f32.mrf.mxu1 }

</bundles_post_ra>
